<compile_context>
chip_gen: v5e
topology: v5e:2x2
jax: 0.10.0
libtpu: 0.0.40
codegen_flags: <defaults>
</compile_context>

<pallas_src>
import functools

import jax
import jax.numpy as jnp
from jax import lax
from jax.experimental import pallas as pl
from jax.experimental.pallas import tpu as pltpu


def _make_decoder_kernel(seq_length: int, hp: int):
    """Builds the decoder kernel for a static seq_length and padded gate width."""

    def kernel(z_ref, wih_ref, whh_ref, bias_ref, wout_ref, bout_ref,
               out_ref, hs_ref):
        bp = z_ref.shape[0]            # sublane-padded batch

        whh = whh_ref[...]             # (HP, 4*HP), rows >= H are zero
        wout = wout_ref[...]           # (HP, OP),   rows >= H are zero

        # Time-invariant input projection (z is repeated every step); both
        # LSTM biases were pre-folded into `bias` by the wrapper.
        x_proj = (jnp.dot(z_ref[...], wih_ref[...],
                          preferred_element_type=jnp.float32)
                  + bias_ref[...])                     # (BP, 4*HP)
        # Lane-tile aligned slices -> free (no lane movement).
        xp_i = x_proj[:, 0 * hp:1 * hp]
        xp_f = x_proj[:, 1 * hp:2 * hp]
        xp_g = x_proj[:, 2 * hp:3 * hp]
        xp_o = x_proj[:, 3 * hp:4 * hp]

        h = jnp.zeros((bp, hp), jnp.float32)
        c = jnp.zeros((bp, hp), jnp.float32)

        # Statically unrolled recurrence (seq_length is a Python int).
        for t in range(seq_length):
            hw = jnp.dot(h, whh, preferred_element_type=jnp.float32)  # (BP, 4*HP)
            i_g = jax.nn.sigmoid(xp_i + hw[:, 0 * hp:1 * hp])
            f_g = jax.nn.sigmoid(xp_f + hw[:, 1 * hp:2 * hp])
            g_g = jnp.tanh(xp_g + hw[:, 2 * hp:3 * hp])
            o_g = jax.nn.sigmoid(xp_o + hw[:, 3 * hp:4 * hp])
            c = f_g * c + i_g * g_g
            h = o_g * jnp.tanh(c)
            # Full-tile (8-sublane aligned, 128-lane dense) unmasked store;
            # off the critical path of the next step's recurrent matmul.
            hs_ref[t * bp:(t + 1) * bp, :] = h

        # Single fc_out matmul over all timesteps + one lane-dense store.
        hs = hs_ref[...]                                              # (seq*BP, HP)
        out = (jnp.dot(hs, wout, preferred_element_type=jnp.float32)
               + bout_ref[...])                                       # (seq*BP, OP)
        out_ref[...] = out.astype(out_ref.dtype)

    return kernel


@functools.partial(jax.jit, static_argnames=("seq_length",))
def decoder_forward(z, params, seq_length):
    """z: (B, latent) -> (B, seq_length, out_dim).  drop_prob = 0 (identity).

    `params` are in PyTorch layout:
      w_ih (4H, latent), w_hh (4H, H), b_ih (4H,), b_hh (4H,),
      w_out (out_dim, H), b_out (out_dim,)   with gate order [i, f, g, o].
    """
    w_ih, w_hh, b_ih, b_hh, w_out, b_out = params
    B, latent = z.shape
    H = w_hh.shape[1]
    out_dim = w_out.shape[0]
    HP = ((H + 127) // 128) * 128        # padded per-gate lane width (>=128)
    OP = ((out_dim + 127) // 128) * 128  # lane-dense output width
    BP = ((B + 7) // 8) * 8              # sublane-aligned batch

    wih_t = w_ih.T.astype(jnp.float32)        # (latent, 4H)
    whh_t = w_hh.T.astype(jnp.float32)        # (H, 4H)
    bias = (b_ih + b_hh).astype(jnp.float32)  # (4H,)  folded biases

    def scatter_gates(src):
        # (rows, 4H) -> (rows, 4*HP): gate k left-aligned in lane tile k.
        rows = src.shape[0]
        dst = jnp.zeros((rows, 4 * HP), jnp.float32)
        for k in range(4):
            dst = dst.at[:, k * HP:k * HP + H].set(src[:, k * H:(k + 1) * H])
        return dst

    wih_pad = scatter_gates(wih_t)                                   # (latent, 4HP)
    whh_pad = jnp.zeros((HP, 4 * HP), jnp.float32)
    whh_pad = whh_pad.at[:H, :].set(scatter_gates(whh_t))            # (HP, 4HP)
    bias_pad = scatter_gates(bias.reshape(1, -1))                    # (1, 4HP)
    wout_pad = jnp.zeros((HP, OP), jnp.float32)
    wout_pad = wout_pad.at[:H, :out_dim].set(w_out.T.astype(jnp.float32))  # (HP, OP)
    bout_pad = jnp.zeros((1, OP), jnp.float32)
    bout_pad = bout_pad.at[:, :out_dim].set(
        b_out.reshape(1, -1).astype(jnp.float32))                    # (1, OP)

    z_pad = jnp.zeros((BP, latent), jnp.float32).at[:B].set(z.astype(jnp.float32))

    vmem = pl.BlockSpec(memory_space=pltpu.MemorySpace.VMEM)
    kernel = _make_decoder_kernel(seq_length, HP)
    out_pad = pl.pallas_call(
        kernel,
        out_shape=jax.ShapeDtypeStruct((seq_length * BP, OP), jnp.float32),
        in_specs=[vmem] * 6,
        out_specs=vmem,
        scratch_shapes=[pltpu.VMEM((seq_length * BP, HP), jnp.float32)],
    )(z_pad, wih_pad, whh_pad, bias_pad, wout_pad, bout_pad)

    # (seq*BP, OP) -> (B, seq, out_dim) to match PyTorch batch_first output.
    out = out_pad.reshape(seq_length, BP, OP)[:, :B, :out_dim]
    return jnp.transpose(out, (1, 0, 2))


def init_params(key, latent_dim, hidden_dim, output_dim):
    """Deterministic synthetic parameters (PyTorch layout, small uniform init)."""
    ks = jax.random.split(key, 6)
    s = 1.0 / jnp.sqrt(hidden_dim)
    w_ih = jax.random.uniform(ks[0], (4 * hidden_dim, latent_dim), jnp.float32, -s, s)
    w_hh = jax.random.uniform(ks[1], (4 * hidden_dim, hidden_dim), jnp.float32, -s, s)
    b_ih = jax.random.uniform(ks[2], (4 * hidden_dim,), jnp.float32, -s, s)
    b_hh = jax.random.uniform(ks[3], (4 * hidden_dim,), jnp.float32, -s, s)
    w_out = jax.random.uniform(ks[4], (output_dim, hidden_dim), jnp.float32, -s, s)
    b_out = jax.random.uniform(ks[5], (output_dim,), jnp.float32, -s, s)
    return (w_ih, w_hh, b_ih, b_hh, w_out, b_out)


def reference_forward(z, params, seq_length):
    """Pure-JAX reference matching torch.nn.LSTM (batch_first) + Linear."""
    w_ih, w_hh, b_ih, b_hh, w_out, b_out = params
    H = w_hh.shape[1]
    x_proj = z @ w_ih.T + b_ih

    def step(carry, _):
        h, c = carry
        gates = x_proj + h @ w_hh.T + b_hh
        i = jax.nn.sigmoid(gates[:, 0 * H:1 * H])
        f = jax.nn.sigmoid(gates[:, 1 * H:2 * H])
        g = jnp.tanh(gates[:, 2 * H:3 * H])
        o = jax.nn.sigmoid(gates[:, 3 * H:4 * H])
        c = f * c + i * g
        h = o * jnp.tanh(c)
        return (h, c), h

    B = z.shape[0]
    init = (jnp.zeros((B, H), jnp.float32), jnp.zeros((B, H), jnp.float32))
    _, hs = lax.scan(step, init, None, length=seq_length)   # (seq, B, H)
    out = hs @ w_out.T + b_out                               # (seq, B, out)
    return jnp.transpose(out, (1, 0, 2))                     # (B, seq, out)


if __name__ == "__main__":
    latent_dim, hidden_dim, output_dim, seq_length = 16, 32, 2, 8
    batch = 2

    key = jax.random.PRNGKey(0)
    k_z, k_p = jax.random.split(key)
    z = jax.random.normal(k_z, (batch, latent_dim), jnp.float32)
    params = init_params(k_p, latent_dim, hidden_dim, output_dim)

    out = decoder_forward(z, params, seq_length)
    out = jax.block_until_ready(out)

    ref = reference_forward(z, params, seq_length)
    assert out.shape == (batch, seq_length, output_dim), out.shape
    assert jnp.allclose(out, ref, rtol=1e-5, atol=1e-5), "mismatch vs reference"

    print("KERNEL_OK")
</pallas_src>

<mosaic_0001>
module attributes {stable_mosaic.version = 11 : i64} {
  func.func @kernel(%arg0: memref<8x16xf32, #tpu.memory_space<vmem>>, %arg1: memref<16x512xf32, #tpu.memory_space<vmem>>, %arg2: memref<128x512xf32, #tpu.memory_space<vmem>>, %arg3: memref<1x512xf32, #tpu.memory_space<vmem>>, %arg4: memref<128x128xf32, #tpu.memory_space<vmem>>, %arg5: memref<1x128xf32, #tpu.memory_space<vmem>>, %arg6: memref<64x128xf32, #tpu.memory_space<vmem>>, %arg7: memref<64x128xf32, #tpu.memory_space<vmem>>) attributes {dimension_semantics = [], scalar_prefetch = 0 : i64, scratch_operands = 1 : i64, tpu.core_type = #tpu.core_type<tc>} {
    %c0 = arith.constant 0 : index
    %c0_0 = arith.constant 0 : index
    %0 = vector.load %arg2[%c0, %c0_0] : memref<128x512xf32, #tpu.memory_space<vmem>>, vector<128x512xf32>
    %c0_1 = arith.constant 0 : index
    %c0_2 = arith.constant 0 : index
    %1 = vector.load %arg4[%c0_1, %c0_2] : memref<128x128xf32, #tpu.memory_space<vmem>>, vector<128x128xf32>
    %c0_3 = arith.constant 0 : index
    %c0_4 = arith.constant 0 : index
    %2 = vector.load %arg0[%c0_3, %c0_4] : memref<8x16xf32, #tpu.memory_space<vmem>>, vector<8x16xf32>
    %c0_5 = arith.constant 0 : index
    %c0_6 = arith.constant 0 : index
    %3 = vector.load %arg1[%c0_5, %c0_6] : memref<16x512xf32, #tpu.memory_space<vmem>>, vector<16x512xf32>
    %cst = arith.constant dense<0.000000e+00> : vector<8x512xf32>
    %4 = tpu.matmul %2, %3, %cst {dimension_numbers = #tpu.dot_dimension_numbers<[1], [0], [0], [1], [0, 0, 1, 1], [], []>} : vector<8x16xf32>, vector<16x512xf32>, vector<8x512xf32> -> vector<8x512xf32>
    %c0_7 = arith.constant 0 : index
    %c0_8 = arith.constant 0 : index
    %5 = vector.load %arg3[%c0_7, %c0_8] : memref<1x512xf32, #tpu.memory_space<vmem>>, vector<1x512xf32>
    %6 = vector.broadcast %5 : vector<1x512xf32> to vector<8x512xf32>
    %7 = arith.addf %4, %6 : vector<8x512xf32>
    %8 = vector.extract_strided_slice %7 {offsets = [0, 0], sizes = [8, 128], strides = [1, 1]} : vector<8x512xf32> to vector<8x128xf32>
    %9 = vector.extract_strided_slice %7 {offsets = [0, 128], sizes = [8, 128], strides = [1, 1]} : vector<8x512xf32> to vector<8x128xf32>
    %10 = vector.extract_strided_slice %7 {offsets = [0, 256], sizes = [8, 128], strides = [1, 1]} : vector<8x512xf32> to vector<8x128xf32>
    %11 = vector.extract_strided_slice %7 {offsets = [0, 384], sizes = [8, 128], strides = [1, 1]} : vector<8x512xf32> to vector<8x128xf32>
    %cst_9 = arith.constant 0.000000e+00 : f32
    %12 = vector.broadcast %cst_9 : f32 to vector<8x128xf32>
    %cst_10 = arith.constant 0.000000e+00 : f32
    %13 = vector.broadcast %cst_10 : f32 to vector<8x128xf32>
    %cst_11 = arith.constant dense<0.000000e+00> : vector<8x512xf32>
    %14 = tpu.matmul %12, %0, %cst_11 {dimension_numbers = #tpu.dot_dimension_numbers<[1], [0], [0], [1], [0, 0, 1, 1], [], []>} : vector<8x128xf32>, vector<128x512xf32>, vector<8x512xf32> -> vector<8x512xf32>
    %15 = vector.extract_strided_slice %14 {offsets = [0, 0], sizes = [8, 128], strides = [1, 1]} : vector<8x512xf32> to vector<8x128xf32>
    %16 = arith.addf %8, %15 : vector<8x128xf32>
    %17 = arith.negf %16 : vector<8x128xf32>
    %18 = math.exp %17 : vector<8x128xf32>
    %cst_12 = arith.constant 1.000000e+00 : f32
    %19 = vector.broadcast %cst_12 : f32 to vector<8x128xf32>
    %20 = arith.addf %19, %18 : vector<8x128xf32>
    %21 = arith.divf %19, %20 : vector<8x128xf32>
    %22 = vector.extract_strided_slice %14 {offsets = [0, 128], sizes = [8, 128], strides = [1, 1]} : vector<8x512xf32> to vector<8x128xf32>
    %23 = arith.addf %9, %22 : vector<8x128xf32>
    %24 = arith.negf %23 : vector<8x128xf32>
    %25 = math.exp %24 : vector<8x128xf32>
    %cst_13 = arith.constant 1.000000e+00 : f32
    %26 = vector.broadcast %cst_13 : f32 to vector<8x128xf32>
    %27 = arith.addf %26, %25 : vector<8x128xf32>
    %28 = arith.divf %26, %27 : vector<8x128xf32>
    %29 = vector.extract_strided_slice %14 {offsets = [0, 256], sizes = [8, 128], strides = [1, 1]} : vector<8x512xf32> to vector<8x128xf32>
    %30 = arith.addf %10, %29 : vector<8x128xf32>
    %31 = math.tanh %30 : vector<8x128xf32>
    %32 = vector.extract_strided_slice %14 {offsets = [0, 384], sizes = [8, 128], strides = [1, 1]} : vector<8x512xf32> to vector<8x128xf32>
    %33 = arith.addf %11, %32 : vector<8x128xf32>
    %34 = arith.negf %33 : vector<8x128xf32>
    %35 = math.exp %34 : vector<8x128xf32>
    %cst_14 = arith.constant 1.000000e+00 : f32
    %36 = vector.broadcast %cst_14 : f32 to vector<8x128xf32>
    %37 = arith.addf %36, %35 : vector<8x128xf32>
    %38 = arith.divf %36, %37 : vector<8x128xf32>
    %39 = arith.mulf %28, %13 : vector<8x128xf32>
    %40 = arith.mulf %21, %31 : vector<8x128xf32>
    %41 = arith.addf %39, %40 : vector<8x128xf32>
    %42 = math.tanh %41 : vector<8x128xf32>
    %43 = arith.mulf %38, %42 : vector<8x128xf32>
    %c0_15 = arith.constant 0 : index
    %c0_16 = arith.constant 0 : index
    %44 = vector.load %arg7[%c0_15, %c0_16] : memref<64x128xf32, #tpu.memory_space<vmem>>, vector<8x128xf32>
    tpu.vector_store %arg7[%c0_15, %c0_16], %43 {strides = array<i32>} : memref<64x128xf32, #tpu.memory_space<vmem>>, vector<8x128xf32>,
    %cst_17 = arith.constant dense<0.000000e+00> : vector<8x512xf32>
    %45 = tpu.matmul %43, %0, %cst_17 {dimension_numbers = #tpu.dot_dimension_numbers<[1], [0], [0], [1], [0, 0, 1, 1], [], []>} : vector<8x128xf32>, vector<128x512xf32>, vector<8x512xf32> -> vector<8x512xf32>
    %46 = vector.extract_strided_slice %45 {offsets = [0, 0], sizes = [8, 128], strides = [1, 1]} : vector<8x512xf32> to vector<8x128xf32>
    %47 = arith.addf %8, %46 : vector<8x128xf32>
    %48 = arith.negf %47 : vector<8x128xf32>
    %49 = math.exp %48 : vector<8x128xf32>
    %cst_18 = arith.constant 1.000000e+00 : f32
    %50 = vector.broadcast %cst_18 : f32 to vector<8x128xf32>
    %51 = arith.addf %50, %49 : vector<8x128xf32>
    %52 = arith.divf %50, %51 : vector<8x128xf32>
    %53 = vector.extract_strided_slice %45 {offsets = [0, 128], sizes = [8, 128], strides = [1, 1]} : vector<8x512xf32> to vector<8x128xf32>
    %54 = arith.addf %9, %53 : vector<8x128xf32>
    %55 = arith.negf %54 : vector<8x128xf32>
    %56 = math.exp %55 : vector<8x128xf32>
    %cst_19 = arith.constant 1.000000e+00 : f32
    %57 = vector.broadcast %cst_19 : f32 to vector<8x128xf32>
    %58 = arith.addf %57, %56 : vector<8x128xf32>
    %59 = arith.divf %57, %58 : vector<8x128xf32>
    %60 = vector.extract_strided_slice %45 {offsets = [0, 256], sizes = [8, 128], strides = [1, 1]} : vector<8x512xf32> to vector<8x128xf32>
    %61 = arith.addf %10, %60 : vector<8x128xf32>
    %62 = math.tanh %61 : vector<8x128xf32>
    %63 = vector.extract_strided_slice %45 {offsets = [0, 384], sizes = [8, 128], strides = [1, 1]} : vector<8x512xf32> to vector<8x128xf32>
    %64 = arith.addf %11, %63 : vector<8x128xf32>
    %65 = arith.negf %64 : vector<8x128xf32>
    %66 = math.exp %65 : vector<8x128xf32>
    %cst_20 = arith.constant 1.000000e+00 : f32
    %67 = vector.broadcast %cst_20 : f32 to vector<8x128xf32>
    %68 = arith.addf %67, %66 : vector<8x128xf32>
    %69 = arith.divf %67, %68 : vector<8x128xf32>
    %70 = arith.mulf %59, %41 : vector<8x128xf32>
    %71 = arith.mulf %52, %62 : vector<8x128xf32>
    %72 = arith.addf %70, %71 : vector<8x128xf32>
    %73 = math.tanh %72 : vector<8x128xf32>
    %74 = arith.mulf %69, %73 : vector<8x128xf32>
    %c8 = arith.constant 8 : index
    %c0_21 = arith.constant 0 : index
    %75 = vector.load %arg7[%c8, %c0_21] : memref<64x128xf32, #tpu.memory_space<vmem>>, vector<8x128xf32>
    tpu.vector_store %arg7[%c8, %c0_21], %74 {strides = array<i32>} : memref<64x128xf32, #tpu.memory_space<vmem>>, vector<8x128xf32>,
    %cst_22 = arith.constant dense<0.000000e+00> : vector<8x512xf32>
    %76 = tpu.matmul %74, %0, %cst_22 {dimension_numbers = #tpu.dot_dimension_numbers<[1], [0], [0], [1], [0, 0, 1, 1], [], []>} : vector<8x128xf32>, vector<128x512xf32>, vector<8x512xf32> -> vector<8x512xf32>
    %77 = vector.extract_strided_slice %76 {offsets = [0, 0], sizes = [8, 128], strides = [1, 1]} : vector<8x512xf32> to vector<8x128xf32>
    %78 = arith.addf %8, %77 : vector<8x128xf32>
    %79 = arith.negf %78 : vector<8x128xf32>
    %80 = math.exp %79 : vector<8x128xf32>
    %cst_23 = arith.constant 1.000000e+00 : f32
    %81 = vector.broadcast %cst_23 : f32 to vector<8x128xf32>
    %82 = arith.addf %81, %80 : vector<8x128xf32>
    %83 = arith.divf %81, %82 : vector<8x128xf32>
    %84 = vector.extract_strided_slice %76 {offsets = [0, 128], sizes = [8, 128], strides = [1, 1]} : vector<8x512xf32> to vector<8x128xf32>
    %85 = arith.addf %9, %84 : vector<8x128xf32>
    %86 = arith.negf %85 : vector<8x128xf32>
    %87 = math.exp %86 : vector<8x128xf32>
    %cst_24 = arith.constant 1.000000e+00 : f32
    %88 = vector.broadcast %cst_24 : f32 to vector<8x128xf32>
    %89 = arith.addf %88, %87 : vector<8x128xf32>
    %90 = arith.divf %88, %89 : vector<8x128xf32>
    %91 = vector.extract_strided_slice %76 {offsets = [0, 256], sizes = [8, 128], strides = [1, 1]} : vector<8x512xf32> to vector<8x128xf32>
    %92 = arith.addf %10, %91 : vector<8x128xf32>
    %93 = math.tanh %92 : vector<8x128xf32>
    %94 = vector.extract_strided_slice %76 {offsets = [0, 384], sizes = [8, 128], strides = [1, 1]} : vector<8x512xf32> to vector<8x128xf32>
    %95 = arith.addf %11, %94 : vector<8x128xf32>
    %96 = arith.negf %95 : vector<8x128xf32>
    %97 = math.exp %96 : vector<8x128xf32>
    %cst_25 = arith.constant 1.000000e+00 : f32
    %98 = vector.broadcast %cst_25 : f32 to vector<8x128xf32>
    %99 = arith.addf %98, %97 : vector<8x128xf32>
    %100 = arith.divf %98, %99 : vector<8x128xf32>
    %101 = arith.mulf %90, %72 : vector<8x128xf32>
    %102 = arith.mulf %83, %93 : vector<8x128xf32>
    %103 = arith.addf %101, %102 : vector<8x128xf32>
    %104 = math.tanh %103 : vector<8x128xf32>
    %105 = arith.mulf %100, %104 : vector<8x128xf32>
    %c16 = arith.constant 16 : index
    %c0_26 = arith.constant 0 : index
    %106 = vector.load %arg7[%c16, %c0_26] : memref<64x128xf32, #tpu.memory_space<vmem>>, vector<8x128xf32>
    tpu.vector_store %arg7[%c16, %c0_26], %105 {strides = array<i32>} : memref<64x128xf32, #tpu.memory_space<vmem>>, vector<8x128xf32>,
    %cst_27 = arith.constant dense<0.000000e+00> : vector<8x512xf32>
    %107 = tpu.matmul %105, %0, %cst_27 {dimension_numbers = #tpu.dot_dimension_numbers<[1], [0], [0], [1], [0, 0, 1, 1], [], []>} : vector<8x128xf32>, vector<128x512xf32>, vector<8x512xf32> -> vector<8x512xf32>
    %108 = vector.extract_strided_slice %107 {offsets = [0, 0], sizes = [8, 128], strides = [1, 1]} : vector<8x512xf32> to vector<8x128xf32>
    %109 = arith.addf %8, %108 : vector<8x128xf32>
    %110 = arith.negf %109 : vector<8x128xf32>
    %111 = math.exp %110 : vector<8x128xf32>
    %cst_28 = arith.constant 1.000000e+00 : f32
    %112 = vector.broadcast %cst_28 : f32 to vector<8x128xf32>
    %113 = arith.addf %112, %111 : vector<8x128xf32>
    %114 = arith.divf %112, %113 : vector<8x128xf32>
    %115 = vector.extract_strided_slice %107 {offsets = [0, 128], sizes = [8, 128], strides = [1, 1]} : vector<8x512xf32> to vector<8x128xf32>
    %116 = arith.addf %9, %115 : vector<8x128xf32>
    %117 = arith.negf %116 : vector<8x128xf32>
    %118 = math.exp %117 : vector<8x128xf32>
    %cst_29 = arith.constant 1.000000e+00 : f32
    %119 = vector.broadcast %cst_29 : f32 to vector<8x128xf32>
    %120 = arith.addf %119, %118 : vector<8x128xf32>
    %121 = arith.divf %119, %120 : vector<8x128xf32>
    %122 = vector.extract_strided_slice %107 {offsets = [0, 256], sizes = [8, 128], strides = [1, 1]} : vector<8x512xf32> to vector<8x128xf32>
    %123 = arith.addf %10, %122 : vector<8x128xf32>
    %124 = math.tanh %123 : vector<8x128xf32>
    %125 = vector.extract_strided_slice %107 {offsets = [0, 384], sizes = [8, 128], strides = [1, 1]} : vector<8x512xf32> to vector<8x128xf32>
    %126 = arith.addf %11, %125 : vector<8x128xf32>
    %127 = arith.negf %126 : vector<8x128xf32>
    %128 = math.exp %127 : vector<8x128xf32>
    %cst_30 = arith.constant 1.000000e+00 : f32
    %129 = vector.broadcast %cst_30 : f32 to vector<8x128xf32>
    %130 = arith.addf %129, %128 : vector<8x128xf32>
    %131 = arith.divf %129, %130 : vector<8x128xf32>
    %132 = arith.mulf %121, %103 : vector<8x128xf32>
    %133 = arith.mulf %114, %124 : vector<8x128xf32>
    %134 = arith.addf %132, %133 : vector<8x128xf32>
    %135 = math.tanh %134 : vector<8x128xf32>
    %136 = arith.mulf %131, %135 : vector<8x128xf32>
    %c24 = arith.constant 24 : index
    %c0_31 = arith.constant 0 : index
    %137 = vector.load %arg7[%c24, %c0_31] : memref<64x128xf32, #tpu.memory_space<vmem>>, vector<8x128xf32>
    tpu.vector_store %arg7[%c24, %c0_31], %136 {strides = array<i32>} : memref<64x128xf32, #tpu.memory_space<vmem>>, vector<8x128xf32>,
    %cst_32 = arith.constant dense<0.000000e+00> : vector<8x512xf32>
    %138 = tpu.matmul %136, %0, %cst_32 {dimension_numbers = #tpu.dot_dimension_numbers<[1], [0], [0], [1], [0, 0, 1, 1], [], []>} : vector<8x128xf32>, vector<128x512xf32>, vector<8x512xf32> -> vector<8x512xf32>
    %139 = vector.extract_strided_slice %138 {offsets = [0, 0], sizes = [8, 128], strides = [1, 1]} : vector<8x512xf32> to vector<8x128xf32>
    %140 = arith.addf %8, %139 : vector<8x128xf32>
    %141 = arith.negf %140 : vector<8x128xf32>
    %142 = math.exp %141 : vector<8x128xf32>
    %cst_33 = arith.constant 1.000000e+00 : f32
    %143 = vector.broadcast %cst_33 : f32 to vector<8x128xf32>
    %144 = arith.addf %143, %142 : vector<8x128xf32>
    %145 = arith.divf %143, %144 : vector<8x128xf32>
    %146 = vector.extract_strided_slice %138 {offsets = [0, 128], sizes = [8, 128], strides = [1, 1]} : vector<8x512xf32> to vector<8x128xf32>
    %147 = arith.addf %9, %146 : vector<8x128xf32>
    %148 = arith.negf %147 : vector<8x128xf32>
    %149 = math.exp %148 : vector<8x128xf32>
    %cst_34 = arith.constant 1.000000e+00 : f32
    %150 = vector.broadcast %cst_34 : f32 to vector<8x128xf32>
    %151 = arith.addf %150, %149 : vector<8x128xf32>
    %152 = arith.divf %150, %151 : vector<8x128xf32>
    %153 = vector.extract_strided_slice %138 {offsets = [0, 256], sizes = [8, 128], strides = [1, 1]} : vector<8x512xf32> to vector<8x128xf32>
    %154 = arith.addf %10, %153 : vector<8x128xf32>
    %155 = math.tanh %154 : vector<8x128xf32>
    %156 = vector.extract_strided_slice %138 {offsets = [0, 384], sizes = [8, 128], strides = [1, 1]} : vector<8x512xf32> to vector<8x128xf32>
    %157 = arith.addf %11, %156 : vector<8x128xf32>
    %158 = arith.negf %157 : vector<8x128xf32>
    %159 = math.exp %158 : vector<8x128xf32>
    %cst_35 = arith.constant 1.000000e+00 : f32
    %160 = vector.broadcast %cst_35 : f32 to vector<8x128xf32>
    %161 = arith.addf %160, %159 : vector<8x128xf32>
    %162 = arith.divf %160, %161 : vector<8x128xf32>
    %163 = arith.mulf %152, %134 : vector<8x128xf32>
    %164 = arith.mulf %145, %155 : vector<8x128xf32>
    %165 = arith.addf %163, %164 : vector<8x128xf32>
    %166 = math.tanh %165 : vector<8x128xf32>
    %167 = arith.mulf %162, %166 : vector<8x128xf32>
    %c32 = arith.constant 32 : index
    %c0_36 = arith.constant 0 : index
    %168 = vector.load %arg7[%c32, %c0_36] : memref<64x128xf32, #tpu.memory_space<vmem>>, vector<8x128xf32>
    tpu.vector_store %arg7[%c32, %c0_36], %167 {strides = array<i32>} : memref<64x128xf32, #tpu.memory_space<vmem>>, vector<8x128xf32>,
    %cst_37 = arith.constant dense<0.000000e+00> : vector<8x512xf32>
    %169 = tpu.matmul %167, %0, %cst_37 {dimension_numbers = #tpu.dot_dimension_numbers<[1], [0], [0], [1], [0, 0, 1, 1], [], []>} : vector<8x128xf32>, vector<128x512xf32>, vector<8x512xf32> -> vector<8x512xf32>
    %170 = vector.extract_strided_slice %169 {offsets = [0, 0], sizes = [8, 128], strides = [1, 1]} : vector<8x512xf32> to vector<8x128xf32>
    %171 = arith.addf %8, %170 : vector<8x128xf32>
    %172 = arith.negf %171 : vector<8x128xf32>
    %173 = math.exp %172 : vector<8x128xf32>
    %cst_38 = arith.constant 1.000000e+00 : f32
    %174 = vector.broadcast %cst_38 : f32 to vector<8x128xf32>
    %175 = arith.addf %174, %173 : vector<8x128xf32>
    %176 = arith.divf %174, %175 : vector<8x128xf32>
    %177 = vector.extract_strided_slice %169 {offsets = [0, 128], sizes = [8, 128], strides = [1, 1]} : vector<8x512xf32> to vector<8x128xf32>
    %178 = arith.addf %9, %177 : vector<8x128xf32>
    %179 = arith.negf %178 : vector<8x128xf32>
    %180 = math.exp %179 : vector<8x128xf32>
    %cst_39 = arith.constant 1.000000e+00 : f32
    %181 = vector.broadcast %cst_39 : f32 to vector<8x128xf32>
    %182 = arith.addf %181, %180 : vector<8x128xf32>
    %183 = arith.divf %181, %182 : vector<8x128xf32>
    %184 = vector.extract_strided_slice %169 {offsets = [0, 256], sizes = [8, 128], strides = [1, 1]} : vector<8x512xf32> to vector<8x128xf32>
    %185 = arith.addf %10, %184 : vector<8x128xf32>
    %186 = math.tanh %185 : vector<8x128xf32>
    %187 = vector.extract_strided_slice %169 {offsets = [0, 384], sizes = [8, 128], strides = [1, 1]} : vector<8x512xf32> to vector<8x128xf32>
    %188 = arith.addf %11, %187 : vector<8x128xf32>
    %189 = arith.negf %188 : vector<8x128xf32>
    %190 = math.exp %189 : vector<8x128xf32>
    %cst_40 = arith.constant 1.000000e+00 : f32
    %191 = vector.broadcast %cst_40 : f32 to vector<8x128xf32>
    %192 = arith.addf %191, %190 : vector<8x128xf32>
    %193 = arith.divf %191, %192 : vector<8x128xf32>
    %194 = arith.mulf %183, %165 : vector<8x128xf32>
    %195 = arith.mulf %176, %186 : vector<8x128xf32>
    %196 = arith.addf %194, %195 : vector<8x128xf32>
    %197 = math.tanh %196 : vector<8x128xf32>
    %198 = arith.mulf %193, %197 : vector<8x128xf32>
    %c40 = arith.constant 40 : index
    %c0_41 = arith.constant 0 : index
    %199 = vector.load %arg7[%c40, %c0_41] : memref<64x128xf32, #tpu.memory_space<vmem>>, vector<8x128xf32>
    tpu.vector_store %arg7[%c40, %c0_41], %198 {strides = array<i32>} : memref<64x128xf32, #tpu.memory_space<vmem>>, vector<8x128xf32>,
    %cst_42 = arith.constant dense<0.000000e+00> : vector<8x512xf32>
    %200 = tpu.matmul %198, %0, %cst_42 {dimension_numbers = #tpu.dot_dimension_numbers<[1], [0], [0], [1], [0, 0, 1, 1], [], []>} : vector<8x128xf32>, vector<128x512xf32>, vector<8x512xf32> -> vector<8x512xf32>
    %201 = vector.extract_strided_slice %200 {offsets = [0, 0], sizes = [8, 128], strides = [1, 1]} : vector<8x512xf32> to vector<8x128xf32>
    %202 = arith.addf %8, %201 : vector<8x128xf32>
    %203 = arith.negf %202 : vector<8x128xf32>
    %204 = math.exp %203 : vector<8x128xf32>
    %cst_43 = arith.constant 1.000000e+00 : f32
    %205 = vector.broadcast %cst_43 : f32 to vector<8x128xf32>
    %206 = arith.addf %205, %204 : vector<8x128xf32>
    %207 = arith.divf %205, %206 : vector<8x128xf32>
    %208 = vector.extract_strided_slice %200 {offsets = [0, 128], sizes = [8, 128], strides = [1, 1]} : vector<8x512xf32> to vector<8x128xf32>
    %209 = arith.addf %9, %208 : vector<8x128xf32>
    %210 = arith.negf %209 : vector<8x128xf32>
    %211 = math.exp %210 : vector<8x128xf32>
    %cst_44 = arith.constant 1.000000e+00 : f32
    %212 = vector.broadcast %cst_44 : f32 to vector<8x128xf32>
    %213 = arith.addf %212, %211 : vector<8x128xf32>
    %214 = arith.divf %212, %213 : vector<8x128xf32>
    %215 = vector.extract_strided_slice %200 {offsets = [0, 256], sizes = [8, 128], strides = [1, 1]} : vector<8x512xf32> to vector<8x128xf32>
    %216 = arith.addf %10, %215 : vector<8x128xf32>
    %217 = math.tanh %216 : vector<8x128xf32>
    %218 = vector.extract_strided_slice %200 {offsets = [0, 384], sizes = [8, 128], strides = [1, 1]} : vector<8x512xf32> to vector<8x128xf32>
    %219 = arith.addf %11, %218 : vector<8x128xf32>
    %220 = arith.negf %219 : vector<8x128xf32>
    %221 = math.exp %220 : vector<8x128xf32>
    %cst_45 = arith.constant 1.000000e+00 : f32
    %222 = vector.broadcast %cst_45 : f32 to vector<8x128xf32>
    %223 = arith.addf %222, %221 : vector<8x128xf32>
    %224 = arith.divf %222, %223 : vector<8x128xf32>
    %225 = arith.mulf %214, %196 : vector<8x128xf32>
    %226 = arith.mulf %207, %217 : vector<8x128xf32>
    %227 = arith.addf %225, %226 : vector<8x128xf32>
    %228 = math.tanh %227 : vector<8x128xf32>
    %229 = arith.mulf %224, %228 : vector<8x128xf32>
    %c48 = arith.constant 48 : index
    %c0_46 = arith.constant 0 : index
    %230 = vector.load %arg7[%c48, %c0_46] : memref<64x128xf32, #tpu.memory_space<vmem>>, vector<8x128xf32>
    tpu.vector_store %arg7[%c48, %c0_46], %229 {strides = array<i32>} : memref<64x128xf32, #tpu.memory_space<vmem>>, vector<8x128xf32>,
    %cst_47 = arith.constant dense<0.000000e+00> : vector<8x512xf32>
    %231 = tpu.matmul %229, %0, %cst_47 {dimension_numbers = #tpu.dot_dimension_numbers<[1], [0], [0], [1], [0, 0, 1, 1], [], []>} : vector<8x128xf32>, vector<128x512xf32>, vector<8x512xf32> -> vector<8x512xf32>
    %232 = vector.extract_strided_slice %231 {offsets = [0, 0], sizes = [8, 128], strides = [1, 1]} : vector<8x512xf32> to vector<8x128xf32>
    %233 = arith.addf %8, %232 : vector<8x128xf32>
    %234 = arith.negf %233 : vector<8x128xf32>
    %235 = math.exp %234 : vector<8x128xf32>
    %cst_48 = arith.constant 1.000000e+00 : f32
    %236 = vector.broadcast %cst_48 : f32 to vector<8x128xf32>
    %237 = arith.addf %236, %235 : vector<8x128xf32>
    %238 = arith.divf %236, %237 : vector<8x128xf32>
    %239 = vector.extract_strided_slice %231 {offsets = [0, 128], sizes = [8, 128], strides = [1, 1]} : vector<8x512xf32> to vector<8x128xf32>
    %240 = arith.addf %9, %239 : vector<8x128xf32>
    %241 = arith.negf %240 : vector<8x128xf32>
    %242 = math.exp %241 : vector<8x128xf32>
    %cst_49 = arith.constant 1.000000e+00 : f32
    %243 = vector.broadcast %cst_49 : f32 to vector<8x128xf32>
    %244 = arith.addf %243, %242 : vector<8x128xf32>
    %245 = arith.divf %243, %244 : vector<8x128xf32>
    %246 = vector.extract_strided_slice %231 {offsets = [0, 256], sizes = [8, 128], strides = [1, 1]} : vector<8x512xf32> to vector<8x128xf32>
    %247 = arith.addf %10, %246 : vector<8x128xf32>
    %248 = math.tanh %247 : vector<8x128xf32>
    %249 = vector.extract_strided_slice %231 {offsets = [0, 384], sizes = [8, 128], strides = [1, 1]} : vector<8x512xf32> to vector<8x128xf32>
    %250 = arith.addf %11, %249 : vector<8x128xf32>
    %251 = arith.negf %250 : vector<8x128xf32>
    %252 = math.exp %251 : vector<8x128xf32>
    %cst_50 = arith.constant 1.000000e+00 : f32
    %253 = vector.broadcast %cst_50 : f32 to vector<8x128xf32>
    %254 = arith.addf %253, %252 : vector<8x128xf32>
    %255 = arith.divf %253, %254 : vector<8x128xf32>
    %256 = arith.mulf %245, %227 : vector<8x128xf32>
    %257 = arith.mulf %238, %248 : vector<8x128xf32>
    %258 = arith.addf %256, %257 : vector<8x128xf32>
    %259 = math.tanh %258 : vector<8x128xf32>
    %260 = arith.mulf %255, %259 : vector<8x128xf32>
    %c56 = arith.constant 56 : index
    %c0_51 = arith.constant 0 : index
    %261 = vector.load %arg7[%c56, %c0_51] : memref<64x128xf32, #tpu.memory_space<vmem>>, vector<8x128xf32>
    tpu.vector_store %arg7[%c56, %c0_51], %260 {strides = array<i32>} : memref<64x128xf32, #tpu.memory_space<vmem>>, vector<8x128xf32>,
    %c0_52 = arith.constant 0 : index
    %c0_53 = arith.constant 0 : index
    %262 = vector.load %arg7[%c0_52, %c0_53] : memref<64x128xf32, #tpu.memory_space<vmem>>, vector<64x128xf32>
    %cst_54 = arith.constant dense<0.000000e+00> : vector<64x128xf32>
    %263 = tpu.matmul %262, %1, %cst_54 {dimension_numbers = #tpu.dot_dimension_numbers<[1], [0], [0], [1], [0, 0, 1, 1], [], []>} : vector<64x128xf32>, vector<128x128xf32>, vector<64x128xf32> -> vector<64x128xf32>
    %c0_55 = arith.constant 0 : index
    %c0_56 = arith.constant 0 : index
    %264 = vector.load %arg5[%c0_55, %c0_56] : memref<1x128xf32, #tpu.memory_space<vmem>>, vector<1x128xf32>
    %265 = vector.broadcast %264 : vector<1x128xf32> to vector<64x128xf32>
    %266 = arith.addf %263, %265 : vector<64x128xf32>
    %c0_57 = arith.constant 0 : index
    %c0_58 = arith.constant 0 : index
    %267 = vector.load %arg6[%c0_57, %c0_58] : memref<64x128xf32, #tpu.memory_space<vmem>>, vector<64x128xf32>
    tpu.vector_store %arg6[%c0_57, %c0_58], %266 {strides = array<i32>} : memref<64x128xf32, #tpu.memory_space<vmem>>, vector<64x128xf32>,
    return
  }
}

</mosaic_0001>

<bundles_post_ra>
// kernel: decoder_forward.1
= control target key start
LH: loop header
LB: loop body
LE: loop exit
PB: predicated region body
PF: predicated region fallthrough
CT: control target
= control target key end

     0   :  { %vm122_vm0 = vcmask 130048   ;;  %v3111_v53 = vmov 0.0   ;;  %s3104_s2 = inlined_call_operand.vmem [shape: f32[128,512], index: 2, kind: input, shape index: {}]   ;;  %s3105_s1 = inlined_call_operand.vmem [shape: f32[16,512], index: 1, kind: input, shape index: {}]   ;;  %s3106_s0 = inlined_call_operand.vmem [shape: f32[8,16], index: 0, kind: input, shape index: {}]   ;;  %s3107_s3 = inlined_call_operand.vmem [shape: f32[1,512], index: 3, kind: input, shape index: {}]   ;;  %s3108_s4 = inlined_call_operand.vmem [shape: f32[128,128], index: 4, kind: input, shape index: {}]   ;;  %s3109_s5 = inlined_call_operand.vmem [shape: f32[1,128], index: 5, kind: input, shape index: {}]   ;;  %s3110_s6 = inlined_call_operand.vmem [shape: f32[64,128], index: 6, kind: output, shape index: {}]  }
   0x1   :  { %v1716_v0 = vld [vmem:[%s3104_s2 + $0x1e0] sm:$0xff]  ;;  %v109_v2 = vld [vmem:[%s3105_s1 + $0x28] sm:$0xff]  ;;  %v1730_v3 = vld [vmem:[%s3104_s2 + $0x1f0] sm:$0xff] }
   0x2   :  { %v1721_v1 = vld [vmem:[%s3104_s2 + $0x1c0] sm:$0xff]  ;;  %206 = vmatpush.msra.mxu1 %v1716_v0  ;;  %160 = vmatpush.msra.mxu3 %v109_v2  ;;  %v105_v5 = vld [vmem:[%s3105_s1 + $0x8] sm:$0xff]  ;;  %v1750_v7 = vld [vmem:[%s3104_s2 + $0x1d0] sm:$0xff] }
   0x3   :  { %v1735_v4 = vld [vmem:[%s3104_s2 + $0x1a0] sm:$0xff]  ;;  %246 = vmatpush.msra.mxu2 %v1730_v3  ;;  %v110_v8 = vld [vmem:[%s3105_s1 + $0x30] sm:$0xff]  ;;  %v111_v14 = vld [vmem:[%s3105_s1 + $0x38] sm:$0xff] }
   0x4   :  { %v1744_v6 = vld [vmem:[%s3106_s0] sm:$0xff]  ;;  %207 = vmatpush.msra.mxu1 %v1721_v1  ;;  %161 = vmatpush.msra.mxu3 %v105_v5  ;;  %v1764_v10 = vld [vmem:[%s3104_s2 + $0x1b0] sm:$0xff]  ;;  %v107_v17 = vld [vmem:[%s3105_s1 + $0x18] sm:$0xff] }
   0x5   :  { %v1758_v9 = vld [vmem:[%s3104_s2 + $0x180] sm:$0xff]  ;;  %247 = vmatpush.msra.mxu2 %v1750_v7  ;;  %1456 = vmatmul.msk.f32.vlgmr.msra.gmra.mxu3 %vm122_vm0, %v1744_v6  ;;  %v106_v11 = vld [vmem:[%s3105_s1 + $0x10] sm:$0xff]  ;;  %v1817_v20 = vld [vmem:[%s3104_s2 + $0x1f8] sm:$0xff] }
   0x6   :  { %208 = vmatpush.msra.mxu1 %v1735_v4  ;;  %v1775_v12 = vld [vmem:[%s3104_s2 + $0x190] sm:$0xff]  ;;  %v1780_v13 = vld [vmem:[%s3104_s2 + $0x160] sm:$0xff]  ;;  %180 = vmatpush.msrb.mxu3 %v110_v8  ;;  %v1839_v24 = vld [vmem:[%s3104_s2 + $0x1d8] sm:$0xff] }
   0x7   :  { %3213 = vst [vmem:[#allocation3_spill] sm:$0xff] %v1780_v13  ;;  %248 = vmatpush.msra.mxu2 %v1764_v10  ;;  %v1790_v15 = vld [vmem:[%s3104_s2 + $0x170] sm:$0xff]  ;;  %v1795_v16 = vld [vmem:[%s3104_s2 + $0x140] sm:$0xff]  ;;  %v1860_v28 = vld [vmem:[%s3104_s2 + $0x1b8] sm:$0xff] }
   0x8   :  { %209 = vmatpush.msra.mxu1 %v1758_v9  ;;  %3214 = vst [vmem:[#allocation4_spill] sm:$0xff] %v1795_v16  ;;  %181 = vmatpush.msrb.mxu3 %v106_v11  ;;  %v1805_v18 = vld [vmem:[%s3104_s2 + $0x150] sm:$0xff]  ;;  %v1810_v19 = vld [vmem:[%s3104_s2 + $0x120] sm:$0xff]  ;;  %v1878_v31 = vld [vmem:[%s3104_s2 + $0x198] sm:$0xff] }
   0x9   :  { %249 = vmatpush.msra.mxu2 %v1775_v12  ;;  %3215 = vst [vmem:[#allocation5_spill] sm:$0xff] %v1810_v19  ;;  %v1822_v21 = vld [vmem:[%s3104_s2 + $0x130] sm:$0xff]  ;;  %v108_v22 = vld [vmem:[%s3105_s1 + $0x20] sm:$0xff]  ;;  %v1898_v34 = vld [vmem:[%s3104_s2 + $0x178] sm:$0xff] }
   0xa   :  { %210 = vmatpush.msra.mxu1 %v1780_v13  ;;  %200 = vmatpush.msra.mxu3 %v111_v14  ;;  %v1830_v23 = vld [vmem:[%s3104_s2 + $0x100] sm:$0xff]  ;;  %v1844_v25 = vld [vmem:[%s3104_s2 + $0x110] sm:$0xff]  ;;  %v1917_v37 = vld [vmem:[%s3104_s2 + $0x158] sm:$0xff] }
   0xb   :  { %250 = vmatpush.msra.mxu2 %v1790_v15  ;;  %3216 = vst [vmem:[#allocation6_spill] sm:$0xff] %v1830_v23  ;;  %140 = vmatpush.msra.mxu0 %v108_v22  ;;  %v104_v26 = vld [vmem:[%s3105_s1] sm:$0xff]  ;;  %v1865_v29 = vld [vmem:[%s3104_s2 + $0xf0] sm:$0xff]  ;;  %v1937_v40 = vld [vmem:[%s3104_s2 + $0x138] sm:$0xff] }
   0xc   :  { %211 = vmatpush.msra.mxu1 %v1795_v16  ;;  %201 = vmatpush.msra.mxu3 %v107_v17  ;;  %v1852_v27 = vld [vmem:[%s3104_s2 + $0xe0] sm:$0xff]  ;;  %v1883_v32 = vld [vmem:[%s3104_s2 + $0xd0] sm:$0xff]  ;;  %v1956_v43 = vld [vmem:[%s3104_s2 + $0x118] sm:$0xff] }
   0xd   :  { %251 = vmatpush.msra.mxu2 %v1805_v18  ;;  %1457 = vmatmul.msk.f32.vlgmr.msrb.gmra.mxu3 %vm122_vm0, %v1744_v6  ;;  %3217 = vst [vmem:[#allocation7_spill] sm:$0xff] %v1852_v27  ;;  %v1870_v30 = vld [vmem:[%s3104_s2 + $0xc0] sm:$0xff]  ;;  %v1903_v35 = vld [vmem:[%s3104_s2 + $0xb0] sm:$0xff]  ;;  %v1975_v46 = vld [vmem:[%s3104_s2 + $0xf8] sm:$0xff] }
   0xe   :  { %212 = vmatpush.msra.mxu1 %v1810_v19  ;;  %266 = vmatpush.msrb.mxu3 %v1817_v20  ;;  %3218 = vst [vmem:[#allocation8_spill] sm:$0xff] %v1870_v30  ;;  %v1890_v33 = vld [vmem:[%s3104_s2 + $0xa0] sm:$0xff]  ;;  %v1922_v38 = vld [vmem:[%s3104_s2 + $0x90] sm:$0xff]  ;;  %v1994_v49 = vld [vmem:[%s3104_s2 + $0xd8] sm:$0xff] }
   0xf   :  { %252 = vmatpush.msra.mxu2 %v1822_v21  ;;  %141 = vmatpush.msra.mxu0 %v104_v26  ;;  %3219 = vst [vmem:[#allocation9_spill] sm:$0xff] %v1890_v33  ;;  %v1909_v36 = vld [vmem:[%s3104_s2 + $0x80] sm:$0xff]  ;;  %v1942_v41 = vld [vmem:[%s3104_s2 + $0x70] sm:$0xff]  ;;  %v2000_v50 = vld [vmem:[%s3104_s2 + $0x1e8] sm:$0xff] }
  0x10   :  { %213 = vmatpush.msra.mxu1 %v1830_v23  ;;  %267 = vmatpush.msrb.mxu3 %v1839_v24  ;;  %3220 = vst [vmem:[#allocation10_spill] sm:$0xff] %v1909_v36  ;;  %v1929_v39 = vld [vmem:[%s3104_s2 + $0x60] sm:$0xff]  ;;  %v1961_v44 = vld [vmem:[%s3104_s2 + $0x50] sm:$0xff]  ;;  %v2013_v52 = vld [vmem:[%s3104_s2 + $0xb8] sm:$0xff] }
  0x11   :  { %253 = vmatpush.msra.mxu2 %v1844_v25  ;;  %1455 = vmatmul.msk.f32.vlgmr.msra.gmra.mxu0 %vm122_vm0, %v1744_v6  ;;  %3221 = vst [vmem:[#allocation11_spill] sm:$0xff] %v1929_v39  ;;  %v1948_v42 = vld [vmem:[%s3104_s2 + $0x40] sm:$0xff]  ;;  %v1980_v47 = vld [vmem:[%s3104_s2 + $0x30] sm:$0xff]  ;;  %v2020_v54 = vld [vmem:[%s3104_s2 + $0x1c8] sm:$0xff] }
  0x12   :  { %214 = vmatpush.msra.mxu1 %v1852_v27  ;;  %268 = vmatpush.msrb.mxu3 %v1860_v28  ;;  %3222 = vst [vmem:[#allocation12_spill] sm:$0xff] %v1948_v42  ;;  %v1967_v45 = vld [vmem:[%s3104_s2 + $0x20] sm:$0xff]  ;;  %v2007_v51 = vld [vmem:[%s3104_s2 + $0x10] sm:$0xff]  ;;  %v2028_v55 = vld [vmem:[%s3104_s2 + $0x98] sm:$0xff] }
  0x13   :  { %254 = vmatpush.msra.mxu2 %v1865_v29  ;;  %502 = vmatpush.msrb.mxu0 %v1716_v0  ;;  %3223 = vst [vmem:[#allocation13_spill] sm:$0xff] %v1961_v44  ;;  %v1986_v48 = vld [vmem:[%s3104_s2] sm:$0xff]  ;;  %v2033_v56 = vld [vmem:[%s3104_s2 + $0x1a8] sm:$0xff]  ;;  %v2041_v57 = vld [vmem:[%s3104_s2 + $0x78] sm:$0xff] }
  0x14   :  { %215 = vmatpush.msra.mxu1 %v1870_v30  ;;  %269 = vmatpush.msrb.mxu3 %v1878_v31  ;;  %3224 = vst [vmem:[#allocation14_spill] sm:$0xff] %v1967_v45  ;;  %v2047_v58 = vld [vmem:[%s3104_s2 + $0x188] sm:$0xff]  ;;  %v2055_v59 = vld [vmem:[%s3104_s2 + $0x58] sm:$0xff] }
  0x15   :  { %255 = vmatpush.msra.mxu2 %v1883_v32  ;;  %1458 = vmatmul.msk.f32.vlgmr.msra.gmra.mxu3 %vm122_vm0, %v1744_v6  ;;  %3225 = vst [vmem:[#allocation15_spill] sm:$0xff] %v1980_v47  ;;  %v2061_v60 = vld [vmem:[%s3104_s2 + $0x168] sm:$0xff]  ;;  %v2069_v61 = vld [vmem:[%s3104_s2 + $0x38] sm:$0xff] }
  0x16   :  { %216 = vmatpush.msra.mxu1 %v1890_v33  ;;  %270 = vmatpush.msrb.mxu3 %v1898_v34  ;;  %3226 = vst [vmem:[#allocation16_spill] sm:$0xff] %v1986_v48  ;;  %v2075_v62 = vld [vmem:[%s3104_s2 + $0x148] sm:$0xff]  ;;  %v2083_v63 = vld [vmem:[%s3104_s2 + $0x18] sm:$0xff] }
  0x17   :  { %256 = vmatpush.msra.mxu2 %v1903_v35  ;;  %503 = vmatpush.msrb.mxu0 %v1721_v1  ;;  %3227 = vst [vmem:[#allocation17_spill] sm:$0xff] %v2007_v51  ;;  %v2089_v2 = vld [vmem:[%s3104_s2 + $0x128] sm:$0xff] }
  0x18   :  { %217 = vmatpush.msra.mxu1 %v1909_v36  ;;  %271 = vmatpush.msrb.mxu3 %v1917_v37  ;;  %3228 = vst [vmem:[#allocation18_spill] sm:$0xff] %v2041_v57  ;;  %v2098_v5 = vld [vmem:[%s3104_s2 + $0x108] sm:$0xff] }
  0x19   :  { %257 = vmatpush.msra.mxu2 %v1922_v38  ;;  %504 = vmatpush.msrb.mxu0 %v1735_v4  ;;  %3229 = vst [vmem:[#allocation19_spill] sm:$0xff] %v2055_v59  ;;  %v2107_v6 = vld [vmem:[%s3104_s2 + $0xe8] sm:$0xff] }
  0x1a   :  { %218 = vmatpush.msra.mxu1 %v1929_v39  ;;  %272 = vmatpush.msrb.mxu3 %v1937_v40  ;;  %3230 = vst [vmem:[#allocation20_spill] sm:$0xff] %v2069_v61  ;;  %v2116_v8 = vld [vmem:[%s3104_s2 + $0xc8] sm:$0xff] }
  0x1b   :  { %258 = vmatpush.msra.mxu2 %v1942_v41  ;;  %505 = vmatpush.msrb.mxu0 %v1758_v9  ;;  %3231 = vst [vmem:[#allocation21_spill] sm:$0xff] %v2083_v63  ;;  %v2125_v11 = vld [vmem:[%s3104_s2 + $0xa8] sm:$0xff] }
  0x1c   :  { %219 = vmatpush.msra.mxu1 %v1948_v42  ;;  %273 = vmatpush.msrb.mxu3 %v1956_v43  ;;  %v2134_v14 = vld [vmem:[%s3104_s2 + $0x88] sm:$0xff] }
  0x1d   :  { %259 = vmatpush.msra.mxu2 %v1961_v44  ;;  %506 = vmatpush.msrb.mxu0 %v1780_v13  ;;  %v2143_v17 = vld [vmem:[%s3104_s2 + $0x68] sm:$0xff] }
  0x1e   :  { %220 = vmatpush.msra.mxu1 %v1967_v45  ;;  %274 = vmatpush.msrb.mxu3 %v1975_v46  ;;  %v2152_v22 = vld [vmem:[%s3104_s2 + $0x48] sm:$0xff] }
  0x1f   :  { %260 = vmatpush.msra.mxu2 %v1980_v47  ;;  %507 = vmatpush.msrb.mxu0 %v1795_v16  ;;  %3232 = vst [vmem:[#allocation22_spill] sm:$0xff] %v2152_v22  ;;  %v2161_v26 = vld [vmem:[%s3104_s2 + $0x28] sm:$0xff] }
  0x20   :  { %221 = vmatpush.msra.mxu1 %v1986_v48  ;;  %275 = vmatpush.msrb.mxu3 %v1994_v49  ;;  %3233 = vst [vmem:[#allocation23_spill] sm:$0xff] %v2161_v26 }
  0x21   :  { %222 = vmatmul.f32.vlgmr.msra.gmra.mxu1 %v3111_v53  ;;  %261 = vmatpush.msra.mxu2 %v2007_v51 }
  0x22   :  { %226 = vmatpush.msrb.mxu1 %v2000_v50  ;;  %276 = vmatpush.msrb.mxu3 %v2013_v52 }
  0x23   :  { %262 = vmatmul.f32.vlgmr.msra.gmra.mxu2 %v3111_v53  ;;  %508 = vmatpush.msrb.mxu0 %v1810_v19 }
  0x24   :  { %227 = vmatpush.msrb.mxu1 %v2020_v54  ;;  %354 = vmatpush.msrb.mxu2 %v1716_v0 }
  0x25   :  { %277 = vmatpush.msrb.mxu3 %v2028_v55  ;;  %509 = vmatpush.msrb.mxu0 %v1830_v23 }
  0x26   :  { %228 = vmatpush.msrb.mxu1 %v2033_v56  ;;  %355 = vmatpush.msrb.mxu2 %v1721_v1 }
  0x27   :  { %278 = vmatpush.msrb.mxu3 %v2041_v57  ;;  %510 = vmatpush.msrb.mxu0 %v1852_v27 }
  0x28   :  { %229 = vmatpush.msrb.mxu1 %v2047_v58  ;;  %356 = vmatpush.msrb.mxu2 %v1735_v4 }
  0x29   :  { %279 = vmatpush.msrb.mxu3 %v2055_v59  ;;  %511 = vmatpush.msrb.mxu0 %v1870_v30 }
  0x2a   :  { %230 = vmatpush.msrb.mxu1 %v2061_v60  ;;  %357 = vmatpush.msrb.mxu2 %v1758_v9 }
  0x2b   :  { %280 = vmatpush.msrb.mxu3 %v2069_v61  ;;  %512 = vmatpush.msrb.mxu0 %v1890_v33 }
  0x2c   :  { %231 = vmatpush.msrb.mxu1 %v2075_v62  ;;  %358 = vmatpush.msrb.mxu2 %v1780_v13 }
  0x2d   :  { %281 = vmatpush.msrb.mxu3 %v2083_v63  ;;  %513 = vmatpush.msrb.mxu0 %v1909_v36 }
  0x2e   :  { %232 = vmatpush.msrb.mxu1 %v2089_v2  ;;  %282 = vmatmul.f32.vlgmr.msrb.gmra.mxu3 %v3111_v53  ;;  %v2170_v53 = vld [vmem:[%s3104_s2 + $0x8] sm:$0xff] }
  0x2f   :  { %359 = vmatpush.msrb.mxu2 %v1795_v16  ;;  %414 = vmatpush.msra.mxu3 %v1817_v20  ;;  %3234 = vst [vmem:[#allocation24_spill] sm:$0xff] %v2170_v53 }
  0x30   :  { %233 = vmatpush.msrb.mxu1 %v2098_v5  ;;  %514 = vmatpush.msrb.mxu0 %v1929_v39 }
  0x31   :  { %360 = vmatpush.msrb.mxu2 %v1810_v19  ;;  %415 = vmatpush.msra.mxu3 %v1839_v24 }
  0x32   :  { %234 = vmatpush.msrb.mxu1 %v2107_v6  ;;  %515 = vmatpush.msrb.mxu0 %v1948_v42 }
  0x33   :  { %361 = vmatpush.msrb.mxu2 %v1830_v23  ;;  %416 = vmatpush.msra.mxu3 %v1860_v28 }
  0x34   :  { %235 = vmatpush.msrb.mxu1 %v2116_v8  ;;  %516 = vmatpush.msrb.mxu0 %v1967_v45 }
  0x35   :  { %362 = vmatpush.msrb.mxu2 %v1852_v27  ;;  %417 = vmatpush.msra.mxu3 %v1878_v31 }
  0x36   :  { %236 = vmatpush.msrb.mxu1 %v2125_v11  ;;  %517 = vmatpush.msrb.mxu0 %v1986_v48 }
  0x37   :  { %363 = vmatpush.msrb.mxu2 %v1870_v30  ;;  %418 = vmatpush.msra.mxu3 %v1898_v34 }
  0x38   :  { %237 = vmatpush.msrb.mxu1 %v2134_v14  ;;  %650 = vmatpush.msra.mxu0 %v1716_v0  ;;  %v3235_v0 = vmov 0.0  }
  0x39   :  { %364 = vmatpush.msrb.mxu2 %v1890_v33  ;;  %419 = vmatpush.msra.mxu3 %v1917_v37 }
  0x3a   :  { %238 = vmatpush.msrb.mxu1 %v2143_v17  ;;  %651 = vmatpush.msra.mxu0 %v1721_v1 }
  0x3b   :  { %365 = vmatpush.msrb.mxu2 %v1909_v36  ;;  %420 = vmatpush.msra.mxu3 %v1937_v40 }
  0x3c   :  { %239 = vmatpush.msrb.mxu1 %v2152_v22  ;;  %652 = vmatpush.msra.mxu0 %v1735_v4  ;;  %v112_v4 = vld [vmem:[%s3107_s3] sm:$0xf] }
  0x3d   :  { %366 = vmatpush.msrb.mxu2 %v1929_v39  ;;  %421 = vmatpush.msra.mxu3 %v1956_v43 }
  0x3e   :  { %240 = vmatpush.msrb.mxu1 %v2161_v26  ;;  %653 = vmatpush.msra.mxu0 %v1758_v9 }
  0x3f   :  { %367 = vmatpush.msrb.mxu2 %v1948_v42  ;;  %422 = vmatpush.msra.mxu3 %v1975_v46 }
  0x40   :  { %241 = vmatpush.msrb.mxu1 %v2170_v53  ;;  %654 = vmatpush.msra.mxu0 %v1780_v13  ;;  %v115_v13 = vperm.slane %v112_v4, 1 }
  0x41   :  { %242 = vmatmul.f32.vlgmr.msrb.gmra.mxu1 %v3235_v0  ;;  %368 = vmatpush.msrb.mxu2 %v1967_v45  ;;  %v114_v0 = vperm.slane %v112_v4, 0 }
  0x42   :  { %374 = vmatpush.msra.mxu1 %v2000_v50  ;;  %423 = vmatpush.msra.mxu3 %v1994_v49 }
  0x43   :  { %369 = vmatpush.msrb.mxu2 %v1986_v48  ;;  %655 = vmatpush.msra.mxu0 %v1795_v16 }
  0x44   :  { %375 = vmatpush.msra.mxu1 %v2020_v54  ;;  %424 = vmatpush.msra.mxu3 %v2013_v52 }
  0x45   :  { %394 = vmatpush.msra.mxu2 %v1730_v3  ;;  %656 = vmatpush.msra.mxu0 %v1810_v19 }
  0x46   :  { %376 = vmatpush.msra.mxu1 %v2033_v56  ;;  %425 = vmatpush.msra.mxu3 %v2028_v55 }
  0x47   :  { %395 = vmatpush.msra.mxu2 %v1750_v7  ;;  %657 = vmatpush.msra.mxu0 %v1830_v23 }
  0x48   :  { %377 = vmatpush.msra.mxu1 %v2047_v58  ;;  %426 = vmatpush.msra.mxu3 %v2041_v57 }
  0x49   :  { %396 = vmatpush.msra.mxu2 %v1764_v10  ;;  %658 = vmatpush.msra.mxu0 %v1852_v27 }
  0x4a   :  { %378 = vmatpush.msra.mxu1 %v2061_v60  ;;  %427 = vmatpush.msra.mxu3 %v2055_v59 }
  0x4b   :  { %397 = vmatpush.msra.mxu2 %v1775_v12  ;;  %659 = vmatpush.msra.mxu0 %v1870_v30  ;;  %v117_v30 = vperm.slane %v112_v4, 3 }
  0x4c   :  { %379 = vmatpush.msra.mxu1 %v2075_v62  ;;  %428 = vmatpush.msra.mxu3 %v2069_v61 }
  0x4d   :  { %398 = vmatpush.msra.mxu2 %v1790_v15  ;;  %660 = vmatpush.msra.mxu0 %v1890_v33 }
  0x4e   :  { %380 = vmatpush.msra.mxu1 %v2089_v2  ;;  %429 = vmatpush.msra.mxu3 %v2083_v63 }
  0x4f   :  { %399 = vmatpush.msra.mxu2 %v1805_v18  ;;  %661 = vmatpush.msra.mxu0 %v1909_v36 }
  0x50   :  { %381 = vmatpush.msra.mxu1 %v2098_v5  ;;  %562 = vmatpush.msrb.mxu3 %v1817_v20 }
  0x51   :  { %400 = vmatpush.msra.mxu2 %v1822_v21  ;;  %662 = vmatpush.msra.mxu0 %v1929_v39 }
  0x52   :  { %382 = vmatpush.msra.mxu1 %v2107_v6  ;;  %563 = vmatpush.msrb.mxu3 %v1839_v24 }
  0x53   :  { %401 = vmatpush.msra.mxu2 %v1844_v25  ;;  %663 = vmatpush.msra.mxu0 %v1948_v42 }
  0x54   :  { %383 = vmatpush.msra.mxu1 %v2116_v8  ;;  %564 = vmatpush.msrb.mxu3 %v1860_v28 }
  0x55   :  { %402 = vmatpush.msra.mxu2 %v1865_v29  ;;  %664 = vmatpush.msra.mxu0 %v1967_v45 }
  0x56   :  { %384 = vmatpush.msra.mxu1 %v2125_v11  ;;  %565 = vmatpush.msrb.mxu3 %v1878_v31 }
  0x57   :  { %403 = vmatpush.msra.mxu2 %v1883_v32  ;;  %665 = vmatpush.msra.mxu0 %v1986_v48 }
  0x58   :  { %385 = vmatpush.msra.mxu1 %v2134_v14  ;;  %566 = vmatpush.msrb.mxu3 %v1898_v34 }
  0x59   :  { %404 = vmatpush.msra.mxu2 %v1903_v35 }
  0x5a   :  { %386 = vmatpush.msra.mxu1 %v2143_v17  ;;  %567 = vmatpush.msrb.mxu3 %v1917_v37 }
  0x5b   :  { %405 = vmatpush.msra.mxu2 %v1922_v38 }
  0x5c   :  { %387 = vmatpush.msra.mxu1 %v2152_v22  ;;  %568 = vmatpush.msrb.mxu3 %v1937_v40 }
  0x5d   :  { %406 = vmatpush.msra.mxu2 %v1942_v41 }
  0x5e   :  { %388 = vmatpush.msra.mxu1 %v2161_v26  ;;  %569 = vmatpush.msrb.mxu3 %v1956_v43 }
  0x5f   :  { %407 = vmatpush.msra.mxu2 %v1961_v44 }
  0x60   :  { %389 = vmatpush.msra.mxu1 %v2170_v53  ;;  %570 = vmatpush.msrb.mxu3 %v1975_v46 }
  0x61   :  { %408 = vmatpush.msra.mxu2 %v1980_v47 }
  0x62   :  { %522 = vmatpush.msrb.mxu1 %v2000_v50  ;;  %571 = vmatpush.msrb.mxu3 %v1994_v49 }
  0x63   :  { %409 = vmatpush.msra.mxu2 %v2007_v51  ;;  %v116_v51 = vperm.slane %v112_v4, 2 }
  0x64   :  { %523 = vmatpush.msrb.mxu1 %v2020_v54  ;;  %572 = vmatpush.msrb.mxu3 %v2013_v52 }
  0x66   :  { %524 = vmatpush.msrb.mxu1 %v2033_v56  ;;  %573 = vmatpush.msrb.mxu3 %v2028_v55 }
  0x68   :  { %525 = vmatpush.msrb.mxu1 %v2047_v58  ;;  %574 = vmatpush.msrb.mxu3 %v2041_v57 }
  0x6a   :  { %526 = vmatpush.msrb.mxu1 %v2061_v60  ;;  %575 = vmatpush.msrb.mxu3 %v2055_v59 }
  0x6c   :  { %527 = vmatpush.msrb.mxu1 %v2075_v62  ;;  %576 = vmatpush.msrb.mxu3 %v2069_v61 }
  0x6e   :  { %528 = vmatpush.msrb.mxu1 %v2089_v2  ;;  %577 = vmatpush.msrb.mxu3 %v2083_v63 }
  0x70   :  { %529 = vmatpush.msrb.mxu1 %v2098_v5 }
  0x72   :  { %530 = vmatpush.msrb.mxu1 %v2107_v6 }
  0x74   :  { %531 = vmatpush.msrb.mxu1 %v2116_v8 }
  0x76   :  { %532 = vmatpush.msrb.mxu1 %v2125_v11 }
  0x78   :  { %533 = vmatpush.msrb.mxu1 %v2134_v14 }
  0x7a   :  { %534 = vmatpush.msrb.mxu1 %v2143_v17 }
  0x7c   :  { %535 = vmatpush.msrb.mxu1 %v2152_v22 }
  0x7e   :  { %536 = vmatpush.msrb.mxu1 %v2161_v26 }
  0x80   :  { %537 = vmatpush.msrb.mxu1 %v2170_v53 }
  0x88   :  { %v163_v1 = vpop.f32.mrf.mxu3 }
  0x89   :  { %v2275_v61 = vadd.f32 %v163_v1, %v115_v13 }
  0x8b   :  { %3238 = vst [vmem:[#allocation27_spill] sm:$0xff] %v2275_v61 }
  0x8e   :  { %v143_v48 = vpop.f32.mrf.mxu0 }
  0x8f   :  { %v2269_v45 = vadd.f32 %v143_v48, %v114_v0 }
  0x90   :  { %v183_v9 = vpop.f32.mrf.mxu3 }
  0x91   :  { %3236 = vst [vmem:[#allocation25_spill] sm:$0xff] %v2269_v45 }
  0x98   :  { %v203_v36 = vpop.f32.mrf.mxu3 }
  0x99   :  { %v2272_v27 = vadd.f32 %v203_v36, %v117_v30 }
  0x9b   :  { %3237 = vst [vmem:[#allocation26_spill] sm:$0xff] %v2272_v27 }
  0x9e   :  { %v223_v42 = vpop.f32.mrf.mxu1 }
  0x9f   :  { %v286_v39 = vadd.f32 %v223_v42, %v2269_v45 }
  0xa1   :  { %v1459_v33 = vmul.f32 -1.442695, %v286_v39 }
  0xa3   :  { %1485 = vpow2.f32 %v1459_v33 }
  0xa6   :  { %v263_v13 = vpop.f32.mrf.mxu2 }
  0xa9   :  { %v1486_v19 = vpop.eup %1485 }
  0xaa   :  { %v290_v63 = vadd.f32 1.0, %v1486_v19 }
  0xac   :  { %1487 = vrcp.f32 %v290_v63  ;;  %vm296_vm1 = vweird.f32 %v290_v63 }
  0xb1   :  { %v283_v23 = vpop.f32.mrf.mxu3 }
  0xb2   :  { %v328_v16 = vadd.f32 %v283_v23, %v2272_v27  ;;  %v1488_v39 = vpop.eup %1487 }
  0xb3   :  { %v292_v30 = vmul.f32 %v1488_v39, %v290_v63  ;;  %vm297_vm2 = vweird.f32 %v1488_v39 }
  0xb4   :  { %v1461_v53 = vmul.f32 -1.442695, %v328_v16  ;;  %v2278_v16 = vadd.f32 %v183_v9, %v116_v51  ;;  %vm298_vm3 = vmor %vm296_vm1, %vm297_vm2 }
  0xb5   :  { %v293_v23 = vsub.f32 1.0, %v292_v30 }
  0xb6   :  { %1489 = vpow2.f32 %v1461_v53  ;;  %3239 = vst [vmem:[#allocation28_spill] sm:$0xff] %v2278_v16 }
  0xb7   :  { %v294_v19 = vmul.f32 %v1488_v39, %v293_v23 }
  0xb9   :  { %v295_v27 = vadd.f32 %v1488_v39, %v294_v19 }
  0xbb   :  { %v299_v9 = vsel %vm298_vm3, %v1488_v39, %v295_v27 }
  0xbc   :  { %v1490_v33 = vpop.eup %1489 }
  0xbd   :  { %v332_v36 = vadd.f32 1.0, %v1490_v33 }
  0xbe   :  { %v243_v48 = vpop.f32.mrf.mxu1 }
  0xbf   :  { %v306_v42 = vadd.f32 %v243_v48, %v2275_v61  ;;  %v300_v48 = vand.u32 2147483647, %v290_v63  ;;  %vm338_vm9 = vweird.f32 %v332_v36 }
  0xc1   :  { %v1460_v0 = vmul.f32 -1.442695, %v306_v42  ;;  %v302_v42 = vand.u32 2147483648, %v290_v63  ;;  %vm301_vm4 = vcmp.eq.f32.partialorder %v300_v48, 8.507059e+37 }
  0xc3   :  { %1491 = vpow2.f32 %v1460_v0  ;;  %v326_v0 = vadd.f32 %v263_v13, %v2278_v16  ;;  %v303_v30 = vor.u32 1.1754944e-38, %v302_v42  ;;  %v344_v42 = vand.u32 2147483648, %v332_v36 }
  0xc4   :  { %1493 = vrcp.f32 %v332_v36 }
  0xc5   :  { %v304_v22 = vsel %vm301_vm4, %v303_v30, %v299_v9  ;;  %v3248_v30 = vld [vmem:[#allocation24_spill] sm:$0xff]  ;;  %v3250_v9 = vld [vmem:[#allocation27_spill] sm:$0xff] }
  0xc9   :  { %v1492_v45 = vpop.eup %1491 }
  0xca   :  { %v310_v26 = vadd.f32 1.0, %v1492_v45  ;;  %v1494_v53 = vpop.eup %1493 }
  0xcb   :  { %v334_v4 = vmul.f32 %v1494_v53, %v332_v36  ;;  %vm339_vm10 = vweird.f32 %v1494_v53 }
  0xcc   :  { %1495 = vrcp.f32 %v310_v26  ;;  %v322_v51 = vand.u32 2147483648, %v310_v26  ;;  %v320_v23 = vand.u32 2147483647, %v310_v26  ;;  %vm316_vm6 = vweird.f32 %v310_v26  ;;  %vm340_vm11 = vmor %vm338_vm9, %vm339_vm10 }
  0xcd   :  { %1497 = vtanh.f32 %v326_v0  ;;  %v335_v59 = vsub.f32 1.0, %v334_v4  ;;  %v342_v0 = vand.u32 2147483647, %v332_v36  ;;  %v3244_v36 = vld [vmem:[#allocation19_spill] sm:$0xff] }
  0xce   :  { %v323_v63 = vor.u32 1.1754944e-38, %v322_v51  ;;  %vm321_vm8 = vcmp.eq.f32.partialorder %v320_v23, 8.507059e+37  ;;  %v3249_v51 = vld [vmem:[#allocation21_spill] sm:$0xff] }
  0xcf   :  { %v336_v16 = vmul.f32 %v1494_v53, %v335_v59  ;;  %vm343_vm12 = vcmp.eq.f32.partialorder %v342_v0, 8.507059e+37  ;;  %v3242_v59 = vld [vmem:[#allocation22_spill] sm:$0xff] }
  0xd1   :  { %v337_v39 = vadd.f32 %v1494_v53, %v336_v16  ;;  %v3245_v16 = vld [vmem:[#allocation23_spill] sm:$0xff] }
  0xd2   :  { %v1496_v1 = vpop.eup %1495 }
  0xd3   :  { %v312_v33 = vmul.f32 %v1496_v1, %v310_v26  ;;  %vm317_vm5 = vweird.f32 %v1496_v1  ;;  %v1498_v19 = vpop.eup %1497  ;;  %v341_v26 = vsel %vm340_vm11, %v1494_v53, %v337_v39  ;;  %v3246_v53 = vld [vmem:[#allocation17_spill] sm:$0xff] }
  0xd4   :  { %vm318_vm7 = vmor %vm316_vm6, %vm317_vm5 }
  0xd5   :  { %v313_v45 = vsub.f32 1.0, %v312_v33  ;;  %v349_v33 = vmul.f32 %v1498_v19, %v304_v22  ;;  %v3243_v22 = vld [vmem:[#allocation15_spill] sm:$0xff]  ;;  %v3251_v19 = vld [vmem:[#allocation25_spill] sm:$0xff] }
  0xd7   :  { %v314_v61 = vmul.f32 %v1496_v1, %v313_v45  ;;  %v3247_v45 = vld [vmem:[#allocation20_spill] sm:$0xff] }
  0xd9   :  { %v315_v47 = vadd.f32 %v1496_v1, %v314_v61  ;;  %v345_v61 = vor.u32 1.1754944e-38, %v344_v42  ;;  %v3252_v42 = vld [vmem:[#allocation26_spill] sm:$0xff] }
  0xdb   :  { %v319_v13 = vsel %vm318_vm7, %v1496_v1, %v315_v47  ;;  %v346_v1 = vsel %vm343_vm12, %v345_v61, %v341_v26 }
  0xdc   :  { %v324_v57 = vsel %vm321_vm8, %v323_v63, %v319_v13 }
  0xdd   :  { %v348_v48 = vmul.f32 0.0, %v324_v57  ;;  %v3241_v57 = vld [vmem:[#allocation18_spill] sm:$0xff] }
  0xdf   :  { %v2281_v27 = vadd.f32 %v349_v33, %v348_v48 }
  0xe1   :  { %1499 = vtanh.f32 %v2281_v27 }
  0xe7   :  { %v1500_v47 = vpop.eup %1499 }
  0xe8   :  { %v2284_v4 = vmul.f32 %v1500_v47, %v346_v1 }
  0xea   :  { %3240 = vst [vmem:[#allocation29_spill] sm:$0xff] %v2284_v4  ;;  %370 = vmatmul.f32.vlgmr.msrb.gmra.mxu2 %v2284_v4  ;;  %390 = vmatmul.f32.vlgmr.msra.gmra.mxu1 %v2284_v4 }
  0xeb   :  { %430 = vmatmul.f32.vlgmr.msra.gmra.mxu3 %v2284_v4  ;;  %542 = vmatpush.msrb.mxu2 %v1730_v3 }
  0xec   :  { %670 = vmatpush.msra.mxu1 %v2000_v50  ;;  %710 = vmatpush.msra.mxu3 %v1817_v20 }
  0xed   :  { %543 = vmatpush.msrb.mxu2 %v1750_v7 }
  0xee   :  { %671 = vmatpush.msra.mxu1 %v2020_v54  ;;  %711 = vmatpush.msra.mxu3 %v1839_v24 }
  0xef   :  { %544 = vmatpush.msrb.mxu2 %v1764_v10 }
  0xf0   :  { %672 = vmatpush.msra.mxu1 %v2033_v56  ;;  %712 = vmatpush.msra.mxu3 %v1860_v28 }
  0xf1   :  { %545 = vmatpush.msrb.mxu2 %v1775_v12 }
  0xf2   :  { %410 = vmatmul.f32.vlgmr.msra.gmra.mxu2 %v2284_v4  ;;  %673 = vmatpush.msra.mxu1 %v2047_v58 }
  0xf3   :  { %546 = vmatpush.msrb.mxu2 %v1790_v15  ;;  %713 = vmatpush.msra.mxu3 %v1878_v31 }
  0xf4   :  { %674 = vmatpush.msra.mxu1 %v2061_v60 }
  0xf5   :  { %547 = vmatpush.msrb.mxu2 %v1805_v18  ;;  %714 = vmatpush.msra.mxu3 %v1898_v34 }
  0xf6   :  { %675 = vmatpush.msra.mxu1 %v2075_v62 }
  0xf7   :  { %548 = vmatpush.msrb.mxu2 %v1822_v21  ;;  %715 = vmatpush.msra.mxu3 %v1917_v37 }
  0xf8   :  { %676 = vmatpush.msra.mxu1 %v2089_v2 }
  0xf9   :  { %549 = vmatpush.msrb.mxu2 %v1844_v25  ;;  %716 = vmatpush.msra.mxu3 %v1937_v40 }
  0xfa   :  { %677 = vmatpush.msra.mxu1 %v2098_v5 }
  0xfb   :  { %550 = vmatpush.msrb.mxu2 %v1865_v29  ;;  %717 = vmatpush.msra.mxu3 %v1956_v43 }
  0xfc   :  { %678 = vmatpush.msra.mxu1 %v2107_v6 }
  0xfd   :  { %551 = vmatpush.msrb.mxu2 %v1883_v32  ;;  %718 = vmatpush.msra.mxu3 %v1975_v46 }
  0xfe   :  { %679 = vmatpush.msra.mxu1 %v2116_v8 }
  0xff   :  { %552 = vmatpush.msrb.mxu2 %v1903_v35  ;;  %719 = vmatpush.msra.mxu3 %v1994_v49 }
 0x100   :  { %680 = vmatpush.msra.mxu1 %v2125_v11 }
 0x101   :  { %553 = vmatpush.msrb.mxu2 %v1922_v38  ;;  %720 = vmatpush.msra.mxu3 %v2013_v52 }
 0x102   :  { %681 = vmatpush.msra.mxu1 %v2134_v14 }
 0x103   :  { %554 = vmatpush.msrb.mxu2 %v1942_v41  ;;  %721 = vmatpush.msra.mxu3 %v2028_v55 }
 0x104   :  { %682 = vmatpush.msra.mxu1 %v2143_v17 }
 0x105   :  { %555 = vmatpush.msrb.mxu2 %v1961_v44  ;;  %722 = vmatpush.msra.mxu3 %v3241_v57 }
 0x106   :  { %683 = vmatpush.msra.mxu1 %v3242_v59 }
 0x107   :  { %556 = vmatpush.msrb.mxu2 %v3243_v22  ;;  %723 = vmatpush.msra.mxu3 %v3244_v36 }
 0x108   :  { %684 = vmatpush.msra.mxu1 %v3245_v16 }
 0x109   :  { %557 = vmatpush.msrb.mxu2 %v3246_v53  ;;  %724 = vmatpush.msra.mxu3 %v3247_v45 }
 0x10a   :  { %685 = vmatpush.msra.mxu1 %v3248_v30 }
 0x10b   :  { %690 = vmatpush.msra.mxu2 %v1730_v3  ;;  %725 = vmatpush.msra.mxu3 %v3249_v51 }
 0x10d   :  { %691 = vmatpush.msra.mxu2 %v1750_v7 }
 0x10f   :  { %692 = vmatpush.msra.mxu2 %v1764_v10 }
 0x111   :  { %693 = vmatpush.msra.mxu2 %v1775_v12 }
 0x113   :  { %694 = vmatpush.msra.mxu2 %v1790_v15 }
 0x115   :  { %695 = vmatpush.msra.mxu2 %v1805_v18 }
 0x117   :  { %696 = vmatpush.msra.mxu2 %v1822_v21 }
 0x119   :  { %697 = vmatpush.msra.mxu2 %v1844_v25 }
 0x11b   :  { %698 = vmatpush.msra.mxu2 %v1865_v29 }
 0x11d   :  { %699 = vmatpush.msra.mxu2 %v1883_v32 }
 0x11f   :  { %700 = vmatpush.msra.mxu2 %v1903_v35 }
 0x121   :  { %701 = vmatpush.msra.mxu2 %v1922_v38 }
 0x123   :  { %702 = vmatpush.msra.mxu2 %v1942_v41 }
 0x125   :  { %703 = vmatpush.msra.mxu2 %v1961_v44 }
 0x127   :  { %704 = vmatpush.msra.mxu2 %v3243_v22 }
 0x129   :  { %705 = vmatpush.msra.mxu2 %v3246_v53 }
 0x167   :  { %v391_v3 = vpop.f32.mrf.mxu1 }
 0x168   :  { %v454_v23 = vadd.f32 %v391_v3, %v3250_v9 }
 0x16a   :  { %v1463_v63 = vmul.f32 -1.442695, %v454_v23 }
 0x16c   :  { %1501 = vpow2.f32 %v1463_v63 }
 0x16d   :  { %v371_v13 = vpop.f32.mrf.mxu2 }
 0x16e   :  { %v434_v33 = vadd.f32 %v371_v13, %v3251_v19  ;;  %v431_v48 = vpop.f32.mrf.mxu3 }
 0x16f   :  { %v476_v39 = vadd.f32 %v431_v48, %v3252_v42  ;;  %v3253_v48 = vld [vmem:[#allocation28_spill] sm:$0xff] }
 0x170   :  { %v1462_v0 = vmul.f32 -1.442695, %v434_v33 }
 0x171   :  { %v1464_v61 = vmul.f32 -1.442695, %v476_v39 }
 0x172   :  { %v1502_v26 = vpop.eup %1501  ;;  %1503 = vpow2.f32 %v1462_v0 }
 0x173   :  { %v458_v47 = vadd.f32 1.0, %v1502_v26  ;;  %1505 = vpow2.f32 %v1464_v61 }
 0x175   :  { %1507 = vrcp.f32 %v458_v47  ;;  %v411_v13 = vpop.f32.mrf.mxu2  ;;  %v470_v61 = vand.u32 2147483648, %v458_v47  ;;  %vm464_vm14 = vweird.f32 %v458_v47 }
 0x176   :  { %v474_v33 = vadd.f32 %v411_v13, %v3253_v48 }
 0x178   :  { %v1504_v1 = vpop.eup %1503 }
 0x179   :  { %v1506_v4 = vpop.eup %1505  ;;  %v438_v51 = vadd.f32 1.0, %v1504_v1  ;;  %v468_v1 = vand.u32 2147483647, %v458_v47 }
 0x17a   :  { %v480_v53 = vadd.f32 1.0, %v1506_v4 }
 0x17b   :  { %v1508_v3 = vpop.eup %1507  ;;  %1509 = vrcp.f32 %v438_v51  ;;  %v450_v4 = vand.u32 2147483648, %v438_v51  ;;  %vm444_vm1 = vweird.f32 %v438_v51  ;;  %vm469_vm2 = vcmp.eq.f32.partialorder %v468_v1, 8.507059e+37  ;;  %v3279_v1 = vld [vmem:[#allocation28_spill] sm:$0xff] }
 0x17c   :  { %v460_v23 = vmul.f32 %v1508_v3, %v458_v47  ;;  %1511 = vrcp.f32 %v480_v53  ;;  %vm465_vm13 = vweird.f32 %v1508_v3  ;;  %vm486_vm6 = vweird.f32 %v480_v53 }
 0x17d   :  { %vm466_vm15 = vmor %vm464_vm14, %vm465_vm13  ;;  %1513 = vtanh.f32 %v474_v33  ;;  %v451_v13 = vor.u32 1.1754944e-38, %v450_v4 }
 0x17e   :  { %v461_v63 = vsub.f32 1.0, %v460_v23  ;;  %v448_v23 = vand.u32 2147483647, %v438_v51 }
 0x180   :  { %v462_v9 = vmul.f32 %v1508_v3, %v461_v63  ;;  %v471_v63 = vor.u32 1.1754944e-38, %v470_v61  ;;  %vm449_vm4 = vcmp.eq.f32.partialorder %v448_v23, 8.507059e+37 }
 0x181   :  { %v1510_v19 = vpop.eup %1509 }
 0x182   :  { %v1512_v39 = vpop.eup %1511  ;;  %v440_v0 = vmul.f32 %v1510_v19, %v438_v51  ;;  %v463_v26 = vadd.f32 %v1508_v3, %v462_v9  ;;  %vm445_vm0 = vweird.f32 %v1510_v19 }
 0x183   :  { %v482_v42 = vmul.f32 %v1512_v39, %v480_v53  ;;  %vm446_vm3 = vmor %vm444_vm1, %vm445_vm0  ;;  %v1514_v44 = vpop.eup %1513  ;;  %vm487_vm5 = vweird.f32 %v1512_v39 }
 0x184   :  { %v441_v30 = vsub.f32 1.0, %v440_v0  ;;  %v467_v22 = vsel %vm466_vm15, %v1508_v3, %v463_v26  ;;  %v492_v26 = vand.u32 2147483648, %v480_v53  ;;  %vm488_vm7 = vmor %vm486_vm6, %vm487_vm5 }
 0x185   :  { %v483_v16 = vsub.f32 1.0, %v482_v42  ;;  %v472_v9 = vsel %vm469_vm2, %v471_v63, %v467_v22 }
 0x186   :  { %v442_v45 = vmul.f32 %v1510_v19, %v441_v30  ;;  %v496_v59 = vmul.f32 %v472_v9, %v2281_v27  ;;  %v493_v22 = vor.u32 1.1754944e-38, %v492_v26  ;;  %v2378_v27 = vld [vmem:[%s3104_s2 + $0x1f0] sm:$0xff] }
 0x187   :  { %v484_v0 = vmul.f32 %v1512_v39, %v483_v16 }
 0x188   :  { %v443_v36 = vadd.f32 %v1510_v19, %v442_v45  ;;  %v490_v45 = vand.u32 2147483647, %v480_v53 }
 0x189   :  { %v485_v3 = vadd.f32 %v1512_v39, %v484_v0 }
 0x18a   :  { %v447_v48 = vsel %vm446_vm3, %v1510_v19, %v443_v36  ;;  %vm491_vm8 = vcmp.eq.f32.partialorder %v490_v45, 8.507059e+37 }
 0x18b   :  { %v452_v47 = vsel %vm449_vm4, %v451_v13, %v447_v48  ;;  %v489_v51 = vsel %vm488_vm7, %v1512_v39, %v485_v3 }
 0x18c   :  { %v497_v33 = vmul.f32 %v1514_v44, %v452_v47  ;;  %v494_v19 = vsel %vm491_vm8, %v493_v22, %v489_v51  ;;  %v2371_v44 = vld [vmem:[%s3104_s2 + $0x1e0] sm:$0xff] }
 0x18e   :  { %v2359_v30 = vadd.f32 %v497_v33, %v496_v59  ;;  %v2385_v59 = vld [vmem:[%s3104_s2 + $0x1c0] sm:$0xff] }
 0x190   :  { %1515 = vtanh.f32 %v2359_v30 }
 0x196   :  { %v1516_v36 = vpop.eup %1515 }
 0x197   :  { %v2362_v16 = vmul.f32 %v1516_v36, %v494_v19 }
 0x199   :  { %3254 = vst [vmem:[#allocation18_spill] sm:$0xff] %v2362_v16  ;;  %518 = vmatmul.f32.vlgmr.msrb.gmra.mxu0 %v2362_v16  ;;  %538 = vmatmul.f32.vlgmr.msrb.gmra.mxu1 %v2362_v16 }
 0x19a   :  { %558 = vmatmul.f32.vlgmr.msrb.gmra.mxu2 %v2362_v16  ;;  %578 = vmatmul.f32.vlgmr.msrb.gmra.mxu3 %v2362_v16  ;;  %v2797_v16 = vld [vmem:[%s3104_s2 + $0x30] sm:$0xff] }
 0x19b   :  { %798 = vmatpush.msrb.mxu0 %v2371_v44  ;;  %818 = vmatpush.msrb.mxu1 %v2000_v50  ;;  %v2394_v50 = vld [vmem:[%s3104_s2 + $0x1a0] sm:$0xff]  ;;  %3301 = vst [vmem:[#allocation30_spill] sm:$0xff] %v2797_v16 }
 0x19c   :  { %838 = vmatpush.msrb.mxu2 %v2378_v27  ;;  %858 = vmatpush.msrb.mxu3 %v1817_v20  ;;  %v2403_v20 = vld [vmem:[%s3104_s2 + $0x180] sm:$0xff] }
 0x19d   :  { %799 = vmatpush.msrb.mxu0 %v2385_v59  ;;  %819 = vmatpush.msrb.mxu1 %v2020_v54 }
 0x19e   :  { %839 = vmatpush.msrb.mxu2 %v1750_v7  ;;  %859 = vmatpush.msrb.mxu3 %v1839_v24  ;;  %v3255_v7 = vld [vmem:[#allocation3_spill] sm:$0xff]  ;;  %v3257_v24 = vld [vmem:[#allocation5_spill] sm:$0xff] }
 0x19f   :  { %800 = vmatpush.msrb.mxu0 %v2394_v50  ;;  %820 = vmatpush.msrb.mxu1 %v2033_v56 }
 0x1a0   :  { %840 = vmatpush.msrb.mxu2 %v1764_v10  ;;  %860 = vmatpush.msrb.mxu3 %v1860_v28  ;;  %v3256_v10 = vld [vmem:[#allocation4_spill] sm:$0xff]  ;;  %v3263_v28 = vld [vmem:[#allocation11_spill] sm:$0xff] }
 0x1a1   :  { %801 = vmatpush.msrb.mxu0 %v2403_v20  ;;  %821 = vmatpush.msrb.mxu1 %v2047_v58  ;;  %v3277_v58 = vld [vmem:[#allocation27_spill] sm:$0xff] }
 0x1a2   :  { %841 = vmatpush.msrb.mxu2 %v1775_v12  ;;  %861 = vmatpush.msrb.mxu3 %v1878_v31  ;;  %v3258_v12 = vld [vmem:[#allocation6_spill] sm:$0xff] }
 0x1a3   :  { %802 = vmatpush.msrb.mxu0 %v3255_v7  ;;  %822 = vmatpush.msrb.mxu1 %v2061_v60  ;;  %v3265_v31 = vld [vmem:[#allocation22_spill] sm:$0xff] }
 0x1a4   :  { %842 = vmatpush.msrb.mxu2 %v1790_v15  ;;  %862 = vmatpush.msrb.mxu3 %v1898_v34  ;;  %v3259_v15 = vld [vmem:[#allocation7_spill] sm:$0xff] }
 0x1a5   :  { %803 = vmatpush.msrb.mxu0 %v3256_v10  ;;  %823 = vmatpush.msrb.mxu1 %v2075_v62  ;;  %v3267_v34 = vld [vmem:[#allocation19_spill] sm:$0xff] }
 0x1a6   :  { %843 = vmatpush.msrb.mxu2 %v1805_v18  ;;  %863 = vmatpush.msrb.mxu3 %v1917_v37  ;;  %v3260_v18 = vld [vmem:[#allocation8_spill] sm:$0xff]  ;;  %v3269_v37 = vld [vmem:[#allocation23_spill] sm:$0xff] }
 0x1a7   :  { %804 = vmatpush.msrb.mxu0 %v3257_v24  ;;  %824 = vmatpush.msrb.mxu1 %v2089_v2 }
 0x1a8   :  { %844 = vmatpush.msrb.mxu2 %v1822_v21  ;;  %864 = vmatpush.msrb.mxu3 %v1937_v40  ;;  %v3261_v21 = vld [vmem:[#allocation9_spill] sm:$0xff]  ;;  %v3271_v40 = vld [vmem:[#allocation20_spill] sm:$0xff] }
 0x1a9   :  { %805 = vmatpush.msrb.mxu0 %v3258_v12  ;;  %825 = vmatpush.msrb.mxu1 %v2098_v5 }
 0x1aa   :  { %845 = vmatpush.msrb.mxu2 %v1844_v25  ;;  %865 = vmatpush.msrb.mxu3 %v1956_v43  ;;  %v3262_v25 = vld [vmem:[#allocation10_spill] sm:$0xff]  ;;  %v3272_v43 = vld [vmem:[#allocation16_spill] sm:$0xff] }
 0x1ab   :  { %806 = vmatpush.msrb.mxu0 %v3259_v15  ;;  %826 = vmatpush.msrb.mxu1 %v2107_v6  ;;  %v3278_v6 = vld [vmem:[#allocation26_spill] sm:$0xff] }
 0x1ac   :  { %846 = vmatpush.msrb.mxu2 %v1865_v29  ;;  %866 = vmatpush.msrb.mxu3 %v1975_v46  ;;  %v3264_v29 = vld [vmem:[#allocation12_spill] sm:$0xff]  ;;  %v3274_v46 = vld [vmem:[#allocation17_spill] sm:$0xff] }
 0x1ad   :  { %807 = vmatpush.msrb.mxu0 %v3260_v18  ;;  %827 = vmatpush.msrb.mxu1 %v2116_v8 }
 0x1ae   :  { %847 = vmatpush.msrb.mxu2 %v1883_v32  ;;  %867 = vmatpush.msrb.mxu3 %v1994_v49  ;;  %v3266_v32 = vld [vmem:[#allocation13_spill] sm:$0xff] }
 0x1af   :  { %808 = vmatpush.msrb.mxu0 %v3261_v21  ;;  %828 = vmatpush.msrb.mxu1 %v2125_v11  ;;  %v3275_v49 = vld [vmem:[#allocation21_spill] sm:$0xff] }
 0x1b0   :  { %848 = vmatpush.msrb.mxu2 %v1903_v35  ;;  %868 = vmatpush.msrb.mxu3 %v2013_v52  ;;  %v3268_v35 = vld [vmem:[#allocation14_spill] sm:$0xff] }
 0x1b1   :  { %809 = vmatpush.msrb.mxu0 %v3262_v25  ;;  %829 = vmatpush.msrb.mxu1 %v2134_v14 }
 0x1b2   :  { %849 = vmatpush.msrb.mxu2 %v1922_v38  ;;  %869 = vmatpush.msrb.mxu3 %v2028_v55  ;;  %v3270_v38 = vld [vmem:[#allocation15_spill] sm:$0xff]  ;;  %v3276_v55 = vld [vmem:[#allocation25_spill] sm:$0xff] }
 0x1b3   :  { %810 = vmatpush.msrb.mxu0 %v3263_v28  ;;  %830 = vmatpush.msrb.mxu1 %v2143_v17 }
 0x1b4   :  { %850 = vmatpush.msrb.mxu2 %v1942_v41  ;;  %870 = vmatpush.msrb.mxu3 %v3241_v57  ;;  %v3273_v41 = vld [vmem:[#allocation24_spill] sm:$0xff] }
 0x1b5   :  { %811 = vmatpush.msrb.mxu0 %v3264_v29  ;;  %831 = vmatpush.msrb.mxu1 %v3265_v31 }
 0x1b6   :  { %851 = vmatpush.msrb.mxu2 %v3266_v32  ;;  %871 = vmatpush.msrb.mxu3 %v3267_v34 }
 0x1b7   :  { %812 = vmatpush.msrb.mxu0 %v3268_v35  ;;  %832 = vmatpush.msrb.mxu1 %v3269_v37 }
 0x1b8   :  { %852 = vmatpush.msrb.mxu2 %v3270_v38  ;;  %872 = vmatpush.msrb.mxu3 %v3271_v40 }
 0x1b9   :  { %813 = vmatpush.msrb.mxu0 %v3272_v43  ;;  %833 = vmatpush.msrb.mxu1 %v3273_v41 }
 0x1ba   :  { %853 = vmatpush.msrb.mxu2 %v3274_v46  ;;  %873 = vmatpush.msrb.mxu3 %v3275_v49 }
 0x216   :  { %v519_v52 = vpop.f32.mrf.mxu0  ;;  %v539_v54 = vpop.f32.mrf.mxu1 }
 0x217   :  { %v582_v56 = vadd.f32 %v519_v52, %v3276_v55  ;;  %v602_v60 = vadd.f32 %v539_v54, %v3277_v58  ;;  %v2482_v52 = vld [vmem:[%s3104_s2 + $0x1f8] sm:$0xff]  ;;  %v2489_v54 = vld [vmem:[%s3104_s2 + $0x1c8] sm:$0xff] }
 0x219   :  { %v1465_v62 = vmul.f32 -1.442695, %v582_v56  ;;  %v1466_v2 = vmul.f32 -1.442695, %v602_v60  ;;  %v2495_v56 = vld [vmem:[%s3104_s2 + $0x1d0] sm:$0xff]  ;;  %v2501_v60 = vld [vmem:[%s3104_s2 + $0x1d8] sm:$0xff] }
 0x21b   :  { %1517 = vpow2.f32 %v1465_v62  ;;  %v2508_v62 = vld [vmem:[%s3104_s2 + $0x1a8] sm:$0xff] }
 0x21c   :  { %1519 = vpow2.f32 %v1466_v2  ;;  %v2514_v2 = vld [vmem:[%s3104_s2 + $0x1b0] sm:$0xff] }
 0x21d   :  { %v579_v5 = vpop.f32.mrf.mxu3  ;;  %v559_v42 = vpop.f32.mrf.mxu2 }
 0x21e   :  { %v624_v8 = vadd.f32 %v579_v5, %v3278_v6  ;;  %v622_v4 = vadd.f32 %v559_v42, %v3279_v1  ;;  %v2520_v5 = vld [vmem:[%s3104_s2 + $0x1b8] sm:$0xff] }
 0x21f   :  { %v2563_v42 = vld [vmem:[%s3104_s2 + $0x178] sm:$0xff] }
 0x220   :  { %v1467_v11 = vmul.f32 -1.442695, %v624_v8  ;;  %v2527_v8 = vld [vmem:[%s3104_s2 + $0x188] sm:$0xff] }
 0x221   :  { %v1518_v14 = vpop.eup %1517 }
 0x222   :  { %v1520_v17 = vpop.eup %1519  ;;  %v586_v57 = vadd.f32 1.0, %v1518_v14  ;;  %1521 = vpow2.f32 %v1467_v11  ;;  %v2533_v11 = vld [vmem:[%s3104_s2 + $0x190] sm:$0xff]  ;;  %v2539_v14 = vld [vmem:[%s3104_s2 + $0x198] sm:$0xff] }
 0x223   :  { %v606_v53 = vadd.f32 1.0, %v1520_v17  ;;  %v2545_v17 = vld [vmem:[%s3104_s2 + $0x160] sm:$0xff] }
 0x224   :  { %1523 = vrcp.f32 %v586_v57  ;;  %v598_v47 = vand.u32 2147483648, %v586_v57  ;;  %v596_v26 = vand.u32 2147483647, %v586_v57  ;;  %vm592_vm11 = vweird.f32 %v586_v57 }
 0x225   :  { %1525 = vrcp.f32 %v606_v53  ;;  %v618_v33 = vand.u32 2147483648, %v606_v53  ;;  %v616_v51 = vand.u32 2147483647, %v606_v53  ;;  %vm612_vm12 = vweird.f32 %v606_v53 }
 0x226   :  { %v599_v19 = vor.u32 1.1754944e-38, %v598_v47  ;;  %vm597_vm15 = vcmp.eq.f32.partialorder %v596_v26, 8.507059e+37  ;;  %v2623_v47 = vld [vmem:[%s3104_s2 + $0x108] sm:$0xff]  ;;  %v2641_v26 = vld [vmem:[%s3104_s2 + $0xe0] sm:$0xff] }
 0x227   :  { %v619_v24 = vor.u32 1.1754944e-38, %v618_v33  ;;  %vm617_vm0 = vcmp.eq.f32.partialorder %v616_v51, 8.507059e+37  ;;  %v2629_v33 = vld [vmem:[%s3104_s2 + $0x110] sm:$0xff] }
 0x228   :  { %v1522_v48 = vpop.eup %1521  ;;  %v2653_v51 = vld [vmem:[%s3104_s2 + $0xf0] sm:$0xff] }
 0x229   :  { %v628_v39 = vadd.f32 1.0, %v1522_v48  ;;  %v2569_v48 = vld [vmem:[%s3104_s2 + $0x140] sm:$0xff] }
 0x22a   :  { %v1524_v61 = vpop.eup %1523 }
 0x22b   :  { %v1526_v23 = vpop.eup %1525  ;;  %v588_v63 = vmul.f32 %v1524_v61, %v586_v57  ;;  %1527 = vrcp.f32 %v628_v39  ;;  %vm593_vm9 = vweird.f32 %v1524_v61  ;;  %v640_v37 = vand.u32 2147483648, %v628_v39  ;;  %v2551_v57 = vld [vmem:[%s3104_s2 + $0x168] sm:$0xff] }
 0x22c   :  { %v608_v13 = vmul.f32 %v1526_v23, %v606_v53  ;;  %1529 = vtanh.f32 %v622_v4  ;;  %vm613_vm10 = vweird.f32 %v1526_v23  ;;  %vm594_vm13 = vmor %vm592_vm11, %vm593_vm9  ;;  %vm634_vm2 = vweird.f32 %v628_v39  ;;  %v2557_v53 = vld [vmem:[%s3104_s2 + $0x170] sm:$0xff]  ;;  %v2587_v4 = vld [vmem:[%s3104_s2 + $0x158] sm:$0xff] }
 0x22d   :  { %v589_v9 = vsub.f32 1.0, %v588_v63  ;;  %vm614_vm14 = vmor %vm612_vm12, %vm613_vm10  ;;  %v638_v38 = vand.u32 2147483647, %v628_v39  ;;  %v641_v43 = vor.u32 1.1754944e-38, %v640_v37  ;;  %v2599_v63 = vld [vmem:[%s3104_s2 + $0x128] sm:$0xff]  ;;  %v2755_v37 = vld [vmem:[%s3104_s2 + $0x78] sm:$0xff] }
 0x22e   :  { %v609_v0 = vsub.f32 1.0, %v608_v13  ;;  %v2605_v13 = vld [vmem:[%s3104_s2 + $0x130] sm:$0xff]  ;;  %3294 = vst [vmem:[#allocation23_spill] sm:$0xff] %v2755_v37 }
 0x22f   :  { %v590_v3 = vmul.f32 %v1524_v61, %v589_v9  ;;  %vm639_vm4 = vcmp.eq.f32.partialorder %v638_v38, 8.507059e+37  ;;  %v2611_v9 = vld [vmem:[%s3104_s2 + $0x138] sm:$0xff]  ;;  %v2761_v38 = vld [vmem:[%s3104_s2 + $0x40] sm:$0xff] }
 0x230   :  { %v610_v45 = vmul.f32 %v1526_v23, %v609_v0  ;;  %v2617_v0 = vld [vmem:[%s3104_s2 + $0x100] sm:$0xff]  ;;  %3295 = vst [vmem:[#allocation15_spill] sm:$0xff] %v2761_v38 }
 0x231   :  { %v1528_v22 = vpop.eup %1527  ;;  %v591_v36 = vadd.f32 %v1524_v61, %v590_v3  ;;  %v2635_v3 = vld [vmem:[%s3104_s2 + $0x118] sm:$0xff] }
 0x232   :  { %v611_v7 = vadd.f32 %v1526_v23, %v610_v45  ;;  %v630_v10 = vmul.f32 %v1528_v22, %v628_v39  ;;  %v1530_v15 = vpop.eup %1529  ;;  %vm635_vm1 = vweird.f32 %v1528_v22  ;;  %v2575_v39 = vld [vmem:[%s3104_s2 + $0x148] sm:$0xff] }
 0x233   :  { %v595_v12 = vsel %vm594_vm13, %v1524_v61, %v591_v36  ;;  %vm636_vm3 = vmor %vm634_vm2, %vm635_vm1  ;;  %v2581_v61 = vld [vmem:[%s3104_s2 + $0x150] sm:$0xff]  ;;  %v2647_v45 = vld [vmem:[%s3104_s2 + $0xe8] sm:$0xff] }
 0x234   :  { %v600_v18 = vsel %vm597_vm15, %v599_v19, %v595_v12  ;;  %v615_v21 = vsel %vm614_vm14, %v1526_v23, %v611_v7  ;;  %v631_v25 = vsub.f32 1.0, %v630_v10  ;;  %v2593_v23 = vld [vmem:[%s3104_s2 + $0x120] sm:$0xff]  ;;  %v2671_v19 = vld [vmem:[%s3104_s2 + $0xc8] sm:$0xff]  ;;  %v2677_v7 = vld [vmem:[%s3104_s2 + $0xd0] sm:$0xff] }
 0x235   :  { %v620_v28 = vsel %vm617_vm0, %v619_v24, %v615_v21  ;;  %v645_v29 = vmul.f32 %v1530_v15, %v600_v18  ;;  %v2665_v36 = vld [vmem:[%s3104_s2 + $0xc0] sm:$0xff]  ;;  %3281 = vst [vmem:[#allocation4_spill] sm:$0xff] %v2677_v7  ;;  %v2683_v10 = vld [vmem:[%s3104_s2 + $0xd8] sm:$0xff]  ;;  %v2695_v12 = vld [vmem:[%s3104_s2 + $0xa8] sm:$0xff] }
 0x236   :  { %v644_v31 = vmul.f32 %v620_v28, %v2359_v30  ;;  %v632_v32 = vmul.f32 %v1528_v22, %v631_v25  ;;  %v2475_v30 = vld [vmem:[%s3104_s2 + $0x1e8] sm:$0xff]  ;;  %3282 = vst [vmem:[#allocation5_spill] sm:$0xff] %v2683_v10  ;;  %v2689_v24 = vld [vmem:[%s3104_s2 + $0xa0] sm:$0xff]  ;;  %v2701_v15 = vld [vmem:[%s3104_s2 + $0xb0] sm:$0xff] }
 0x237   :  { %3283 = vst [vmem:[#allocation6_spill] sm:$0xff] %v2689_v24  ;;  %v2707_v18 = vld [vmem:[%s3104_s2 + $0xb8] sm:$0xff]  ;;  %v2713_v21 = vld [vmem:[%s3104_s2 + $0x80] sm:$0xff]  ;;  %v2719_v25 = vld [vmem:[%s3104_s2 + $0x88] sm:$0xff] }
 0x238   :  { %v2462_v34 = vadd.f32 %v645_v29, %v644_v31  ;;  %v633_v35 = vadd.f32 %v1528_v22, %v632_v32  ;;  %3284 = vst [vmem:[#allocation7_spill] sm:$0xff] %v2695_v12  ;;  %v2725_v28 = vld [vmem:[%s3104_s2 + $0x90] sm:$0xff]  ;;  %v2731_v29 = vld [vmem:[%s3104_s2 + $0x98] sm:$0xff]  ;;  %v2737_v31 = vld [vmem:[%s3104_s2 + $0x60] sm:$0xff] }
 0x239   :  { %3285 = vst [vmem:[#allocation8_spill] sm:$0xff] %v2701_v15  ;;  %v2743_v32 = vld [vmem:[%s3104_s2 + $0x68] sm:$0xff] }
 0x23a   :  { %1531 = vtanh.f32 %v2462_v34  ;;  %v637_v40 = vsel %vm636_vm3, %v1528_v22, %v633_v35  ;;  %v2659_v22 = vld [vmem:[%s3104_s2 + $0xf8] sm:$0xff]  ;;  %3286 = vst [vmem:[#allocation9_spill] sm:$0xff] %v2707_v18  ;;  %v2749_v35 = vld [vmem:[%s3104_s2 + $0x70] sm:$0xff] }
 0x23b   :  { %v642_v46 = vsel %vm639_vm4, %v641_v43, %v637_v40  ;;  %3287 = vst [vmem:[#allocation10_spill] sm:$0xff] %v2713_v21  ;;  %v2767_v40 = vld [vmem:[%s3104_s2 + $0x48] sm:$0xff]  ;;  %v2773_v43 = vld [vmem:[%s3104_s2 + $0x50] sm:$0xff] }
 0x23c   :  { %3288 = vst [vmem:[#allocation11_spill] sm:$0xff] %v2719_v25 }
 0x23d   :  { %3289 = vst [vmem:[#allocation12_spill] sm:$0xff] %v2725_v28 }
 0x23e   :  { %3290 = vst [vmem:[#allocation22_spill] sm:$0xff] %v2731_v29 }
 0x23f   :  { %3291 = vst [vmem:[#allocation13_spill] sm:$0xff] %v2737_v31 }
 0x240   :  { %v1532_v41 = vpop.eup %1531  ;;  %3292 = vst [vmem:[#allocation19_spill] sm:$0xff] %v2743_v32 }
 0x241   :  { %v2465_v49 = vmul.f32 %v1532_v41, %v642_v46  ;;  %3293 = vst [vmem:[#allocation14_spill] sm:$0xff] %v2749_v35  ;;  %v2779_v41 = vld [vmem:[%s3104_s2 + $0x58] sm:$0xff]  ;;  %v2785_v46 = vld [vmem:[%s3104_s2 + $0x20] sm:$0xff] }
 0x242   :  { %3296 = vst [vmem:[#allocation20_spill] sm:$0xff] %v2767_v40 }
 0x243   :  { %3280 = vst [vmem:[#allocation3_spill] sm:$0xff] %v2465_v49  ;;  %666 = vmatmul.f32.vlgmr.msra.gmra.mxu0 %v2465_v49  ;;  %686 = vmatmul.f32.vlgmr.msra.gmra.mxu1 %v2465_v49 }
 0x244   :  { %706 = vmatmul.f32.vlgmr.msra.gmra.mxu2 %v2465_v49  ;;  %726 = vmatmul.f32.vlgmr.msra.gmra.mxu3 %v2465_v49  ;;  %3297 = vst [vmem:[#allocation16_spill] sm:$0xff] %v2773_v43  ;;  %v2791_v49 = vld [vmem:[%s3104_s2 + $0x28] sm:$0xff] }
 0x245   :  { %946 = vmatpush.msra.mxu0 %v2371_v44  ;;  %966 = vmatpush.msra.mxu1 %v2475_v30  ;;  %3298 = vst [vmem:[#allocation24_spill] sm:$0xff] %v2779_v41 }
 0x246   :  { %986 = vmatpush.msra.mxu2 %v2378_v27  ;;  %1006 = vmatpush.msra.mxu3 %v2482_v52  ;;  %3299 = vst [vmem:[#allocation17_spill] sm:$0xff] %v2785_v46 }
 0x247   :  { %947 = vmatpush.msra.mxu0 %v2385_v59  ;;  %967 = vmatpush.msra.mxu1 %v2489_v54  ;;  %3300 = vst [vmem:[#allocation21_spill] sm:$0xff] %v2791_v49 }
 0x248   :  { %987 = vmatpush.msra.mxu2 %v2495_v56  ;;  %1007 = vmatpush.msra.mxu3 %v2501_v60 }
 0x249   :  { %948 = vmatpush.msra.mxu0 %v2394_v50  ;;  %968 = vmatpush.msra.mxu1 %v2508_v62 }
 0x24a   :  { %988 = vmatpush.msra.mxu2 %v2514_v2  ;;  %1008 = vmatpush.msra.mxu3 %v2520_v5 }
 0x24b   :  { %949 = vmatpush.msra.mxu0 %v2403_v20  ;;  %969 = vmatpush.msra.mxu1 %v2527_v8 }
 0x24c   :  { %989 = vmatpush.msra.mxu2 %v2533_v11  ;;  %1009 = vmatpush.msra.mxu3 %v2539_v14 }
 0x24d   :  { %950 = vmatpush.msra.mxu0 %v2545_v17  ;;  %970 = vmatpush.msra.mxu1 %v2551_v57 }
 0x24e   :  { %990 = vmatpush.msra.mxu2 %v2557_v53  ;;  %1010 = vmatpush.msra.mxu3 %v2563_v42 }
 0x24f   :  { %951 = vmatpush.msra.mxu0 %v2569_v48  ;;  %971 = vmatpush.msra.mxu1 %v2575_v39 }
 0x250   :  { %991 = vmatpush.msra.mxu2 %v2581_v61  ;;  %1011 = vmatpush.msra.mxu3 %v2587_v4 }
 0x251   :  { %952 = vmatpush.msra.mxu0 %v2593_v23  ;;  %972 = vmatpush.msra.mxu1 %v2599_v63 }
 0x252   :  { %992 = vmatpush.msra.mxu2 %v2605_v13  ;;  %1012 = vmatpush.msra.mxu3 %v2611_v9 }
 0x253   :  { %953 = vmatpush.msra.mxu0 %v2617_v0  ;;  %973 = vmatpush.msra.mxu1 %v2623_v47 }
 0x254   :  { %993 = vmatpush.msra.mxu2 %v2629_v33  ;;  %1013 = vmatpush.msra.mxu3 %v2635_v3 }
 0x255   :  { %954 = vmatpush.msra.mxu0 %v2641_v26  ;;  %974 = vmatpush.msra.mxu1 %v2647_v45 }
 0x256   :  { %994 = vmatpush.msra.mxu2 %v2653_v51  ;;  %1014 = vmatpush.msra.mxu3 %v2659_v22 }
 0x257   :  { %955 = vmatpush.msra.mxu0 %v2665_v36  ;;  %975 = vmatpush.msra.mxu1 %v2671_v19 }
 0x258   :  { %995 = vmatpush.msra.mxu2 %v2677_v7  ;;  %1015 = vmatpush.msra.mxu3 %v2683_v10 }
 0x259   :  { %956 = vmatpush.msra.mxu0 %v2689_v24  ;;  %976 = vmatpush.msra.mxu1 %v2695_v12 }
 0x25a   :  { %996 = vmatpush.msra.mxu2 %v2701_v15  ;;  %1016 = vmatpush.msra.mxu3 %v2707_v18 }
 0x25b   :  { %957 = vmatpush.msra.mxu0 %v2713_v21  ;;  %977 = vmatpush.msra.mxu1 %v2719_v25 }
 0x25c   :  { %997 = vmatpush.msra.mxu2 %v2725_v28  ;;  %1017 = vmatpush.msra.mxu3 %v2731_v29 }
 0x25d   :  { %958 = vmatpush.msra.mxu0 %v2737_v31  ;;  %978 = vmatpush.msra.mxu1 %v2743_v32 }
 0x25e   :  { %998 = vmatpush.msra.mxu2 %v2749_v35  ;;  %1018 = vmatpush.msra.mxu3 %v2755_v37 }
 0x25f   :  { %959 = vmatpush.msra.mxu0 %v2761_v38  ;;  %979 = vmatpush.msra.mxu1 %v2767_v40 }
 0x260   :  { %999 = vmatpush.msra.mxu2 %v2773_v43  ;;  %1019 = vmatpush.msra.mxu3 %v2779_v41  ;;  %v2803_v41 = vld [vmem:[%s3104_s2 + $0x38] sm:$0xff] }
 0x261   :  { %960 = vmatpush.msra.mxu0 %v2785_v46  ;;  %980 = vmatpush.msra.mxu1 %v2791_v49  ;;  %3302 = vst [vmem:[#allocation31_spill] sm:$0xff] %v2803_v41  ;;  %v2809_v46 = vld [vmem:[%s3104_s2] sm:$0xff]  ;;  %v2815_v49 = vld [vmem:[%s3104_s2 + $0x8] sm:$0xff] }
 0x262   :  { %1000 = vmatpush.msra.mxu2 %v2797_v16  ;;  %1020 = vmatpush.msra.mxu3 %v2803_v41  ;;  %3303 = vst [vmem:[#allocation32_spill] sm:$0xff] %v2809_v46  ;;  %v2821_v16 = vld [vmem:[%s3104_s2 + $0x10] sm:$0xff]  ;;  %v2827_v41 = vld [vmem:[%s3104_s2 + $0x18] sm:$0xff] }
 0x263   :  { %961 = vmatpush.msra.mxu0 %v2809_v46  ;;  %3304 = vst [vmem:[#allocation33_spill] sm:$0xff] %v2815_v49  ;;  %981 = vmatpush.msra.mxu1 %v2815_v49 }
 0x264   :  { %3305 = vst [vmem:[#allocation34_spill] sm:$0xff] %v2821_v16  ;;  %1001 = vmatpush.msra.mxu2 %v2821_v16  ;;  %1021 = vmatpush.msra.mxu3 %v2827_v41 }
 0x265   :  { %3306 = vst [vmem:[#allocation35_spill] sm:$0xff] %v2827_v41 }
 0x2c0   :  { %v667_v46 = vpop.f32.mrf.mxu0  ;;  %v687_v43 = vpop.f32.mrf.mxu1 }
 0x2c1   :  { %v730_v40 = vadd.f32 %v667_v46, %v3276_v55  ;;  %v750_v49 = vadd.f32 %v687_v43, %v3277_v58 }
 0x2c3   :  { %v1468_v38 = vmul.f32 -1.442695, %v730_v40  ;;  %v1469_v37 = vmul.f32 -1.442695, %v750_v49 }
 0x2c5   :  { %1533 = vpow2.f32 %v1468_v38 }
 0x2c6   :  { %1535 = vpow2.f32 %v1469_v37 }
 0x2c7   :  { %v727_v35 = vpop.f32.mrf.mxu3  ;;  %v707_v41 = vpop.f32.mrf.mxu2 }
 0x2c8   :  { %v772_v16 = vadd.f32 %v727_v35, %v3278_v6  ;;  %v770_v40 = vadd.f32 %v707_v41, %v3279_v1 }
 0x2ca   :  { %v1470_v32 = vmul.f32 -1.442695, %v772_v16 }
 0x2cb   :  { %v1534_v31 = vpop.eup %1533 }
 0x2cc   :  { %v1536_v29 = vpop.eup %1535  ;;  %v734_v28 = vadd.f32 1.0, %v1534_v31  ;;  %1537 = vpow2.f32 %v1470_v32 }
 0x2cd   :  { %v754_v25 = vadd.f32 1.0, %v1536_v29 }
 0x2ce   :  { %1539 = vrcp.f32 %v734_v28  ;;  %v746_v16 = vand.u32 2147483648, %v734_v28  ;;  %v744_v29 = vand.u32 2147483647, %v734_v28  ;;  %vm740_vm7 = vweird.f32 %v734_v28 }
 0x2cf   :  { %1541 = vrcp.f32 %v754_v25  ;;  %v766_v6 = vand.u32 2147483648, %v754_v25  ;;  %v764_v58 = vand.u32 2147483647, %v754_v25  ;;  %vm760_vm8 = vweird.f32 %v754_v25 }
 0x2d0   :  { %v747_v41 = vor.u32 1.1754944e-38, %v746_v16  ;;  %vm745_vm11 = vcmp.eq.f32.partialorder %v744_v29, 8.507059e+37 }
 0x2d1   :  { %vm765_vm12 = vcmp.eq.f32.partialorder %v764_v58, 8.507059e+37 }
 0x2d2   :  { %v1538_v21 = vpop.eup %1537 }
 0x2d3   :  { %v776_v46 = vadd.f32 1.0, %v1538_v21 }
 0x2d4   :  { %v1540_v55 = vpop.eup %1539 }
 0x2d5   :  { %v1542_v49 = vpop.eup %1541  ;;  %v736_v38 = vmul.f32 %v1540_v55, %v734_v28  ;;  %1543 = vrcp.f32 %v776_v46  ;;  %vm741_vm5 = vweird.f32 %v1540_v55  ;;  %v788_v16 = vand.u32 2147483648, %v776_v46 }
 0x2d6   :  { %v756_v37 = vmul.f32 %v1542_v49, %v754_v25  ;;  %1545 = vtanh.f32 %v770_v40  ;;  %vm761_vm6 = vweird.f32 %v1542_v49  ;;  %vm742_vm9 = vmor %vm740_vm7, %vm741_vm5  ;;  %vm782_vm14 = vweird.f32 %v776_v46 }
 0x2d7   :  { %v737_v43 = vsub.f32 1.0, %v736_v38  ;;  %vm762_vm10 = vmor %vm760_vm8, %vm761_vm6  ;;  %v767_v38 = vor.u32 1.1754944e-38, %v766_v6  ;;  %v789_v29 = vor.u32 1.1754944e-38, %v788_v16  ;;  %v3326_v16 = vld [vmem:[#allocation17_spill] sm:$0xff] }
 0x2d8   :  { %v757_v35 = vsub.f32 1.0, %v756_v37 }
 0x2d9   :  { %v738_v31 = vmul.f32 %v1540_v55, %v737_v43 }
 0x2da   :  { %v758_v32 = vmul.f32 %v1542_v49, %v757_v35 }
 0x2db   :  { %v1544_v18 = vpop.eup %1543  ;;  %v739_v21 = vadd.f32 %v1540_v55, %v738_v31 }
 0x2dc   :  { %v759_v1 = vadd.f32 %v1542_v49, %v758_v32  ;;  %v778_v15 = vmul.f32 %v1544_v18, %v776_v46  ;;  %v1546_v40 = vpop.eup %1545  ;;  %vm783_vm13 = vweird.f32 %v1544_v18  ;;  %v3316_v32 = vld [vmem:[#allocation12_spill] sm:$0xff] }
 0x2dd   :  { %v743_v37 = vsel %vm742_vm9, %v1540_v55, %v739_v21  ;;  %v786_v55 = vand.u32 2147483647, %v776_v46  ;;  %vm784_vm15 = vmor %vm782_vm14, %vm783_vm13  ;;  %v3314_v46 = vld [vmem:[#allocation10_spill] sm:$0xff] }
 0x2de   :  { %v748_v12 = vsel %vm745_vm11, %v747_v41, %v743_v37  ;;  %v763_v43 = vsel %vm762_vm10, %v1542_v49, %v759_v1  ;;  %v779_v24 = vsub.f32 1.0, %v778_v15  ;;  %v3315_v49 = vld [vmem:[#allocation11_spill] sm:$0xff]  ;;  %v3317_v21 = vld [vmem:[#allocation22_spill] sm:$0xff]  ;;  %v3318_v41 = vld [vmem:[#allocation13_spill] sm:$0xff] }
 0x2df   :  { %v768_v35 = vsel %vm765_vm12, %v767_v38, %v763_v43  ;;  %v793_v10 = vmul.f32 %v1546_v40, %v748_v12  ;;  %vm787_vm0 = vcmp.eq.f32.partialorder %v786_v55, 8.507059e+37  ;;  %v3312_v12 = vld [vmem:[#allocation8_spill] sm:$0xff]  ;;  %v3319_v38 = vld [vmem:[#allocation19_spill] sm:$0xff]  ;;  %v3320_v37 = vld [vmem:[#allocation14_spill] sm:$0xff] }
 0x2e0   :  { %v792_v7 = vmul.f32 %v768_v35, %v2462_v34  ;;  %v780_v31 = vmul.f32 %v1544_v18, %v779_v24  ;;  %v3308_v34 = vld [vmem:[#allocation4_spill] sm:$0xff]  ;;  %v3311_v24 = vld [vmem:[#allocation7_spill] sm:$0xff]  ;;  %v3327_v55 = vld [vmem:[#allocation21_spill] sm:$0xff] }
 0x2e1   :  { %v3321_v40 = vld [vmem:[#allocation23_spill] sm:$0xff]  ;;  %v3323_v35 = vld [vmem:[#allocation20_spill] sm:$0xff] }
 0x2e2   :  { %v2835_v28 = vadd.f32 %v793_v10, %v792_v7  ;;  %v781_v25 = vadd.f32 %v1544_v18, %v780_v31  ;;  %v3309_v7 = vld [vmem:[#allocation5_spill] sm:$0xff]  ;;  %v3310_v10 = vld [vmem:[#allocation6_spill] sm:$0xff]  ;;  %v3322_v43 = vld [vmem:[#allocation15_spill] sm:$0xff] }
 0x2e3   :  { %v3324_v31 = vld [vmem:[#allocation16_spill] sm:$0xff] }
 0x2e4   :  { %1547 = vtanh.f32 %v2835_v28  ;;  %v785_v6 = vsel %vm784_vm15, %v1544_v18, %v781_v25  ;;  %v3313_v18 = vld [vmem:[#allocation9_spill] sm:$0xff]  ;;  %v3325_v25 = vld [vmem:[#allocation24_spill] sm:$0xff] }
 0x2e5   :  { %v790_v1 = vsel %vm787_vm0, %v789_v29, %v785_v6  ;;  %v3328_v6 = vld [vmem:[#allocation30_spill] sm:$0xff]  ;;  %v3329_v29 = vld [vmem:[#allocation31_spill] sm:$0xff] }
 0x2ea   :  { %v1548_v58 = vpop.eup %1547 }
 0x2eb   :  { %v2838_v15 = vmul.f32 %v1548_v58, %v790_v1  ;;  %v3330_v58 = vld [vmem:[#allocation32_spill] sm:$0xff]  ;;  %v3331_v1 = vld [vmem:[#allocation33_spill] sm:$0xff] }
 0x2ed   :  { %3307 = vst [vmem:[#allocation36_spill] sm:$0xff] %v2838_v15  ;;  %814 = vmatmul.f32.vlgmr.msrb.gmra.mxu0 %v2838_v15  ;;  %834 = vmatmul.f32.vlgmr.msrb.gmra.mxu1 %v2838_v15 }
 0x2ee   :  { %854 = vmatmul.f32.vlgmr.msrb.gmra.mxu2 %v2838_v15  ;;  %874 = vmatmul.f32.vlgmr.msrb.gmra.mxu3 %v2838_v15  ;;  %v3332_v15 = vld [vmem:[#allocation34_spill] sm:$0xff] }
 0x2ef   :  { %1094 = vmatpush.msrb.mxu0 %v2371_v44  ;;  %1114 = vmatpush.msrb.mxu1 %v2475_v30 }
 0x2f0   :  { %1134 = vmatpush.msrb.mxu2 %v2378_v27  ;;  %1154 = vmatpush.msrb.mxu3 %v2482_v52 }
 0x2f1   :  { %1095 = vmatpush.msrb.mxu0 %v2385_v59  ;;  %1115 = vmatpush.msrb.mxu1 %v2489_v54 }
 0x2f2   :  { %1135 = vmatpush.msrb.mxu2 %v2495_v56  ;;  %1155 = vmatpush.msrb.mxu3 %v2501_v60 }
 0x2f3   :  { %1096 = vmatpush.msrb.mxu0 %v2394_v50  ;;  %1116 = vmatpush.msrb.mxu1 %v2508_v62 }
 0x2f4   :  { %1136 = vmatpush.msrb.mxu2 %v2514_v2  ;;  %1156 = vmatpush.msrb.mxu3 %v2520_v5 }
 0x2f5   :  { %1097 = vmatpush.msrb.mxu0 %v2403_v20  ;;  %1117 = vmatpush.msrb.mxu1 %v2527_v8 }
 0x2f6   :  { %1137 = vmatpush.msrb.mxu2 %v2533_v11  ;;  %1157 = vmatpush.msrb.mxu3 %v2539_v14 }
 0x2f7   :  { %1098 = vmatpush.msrb.mxu0 %v2545_v17  ;;  %1118 = vmatpush.msrb.mxu1 %v2551_v57 }
 0x2f8   :  { %1138 = vmatpush.msrb.mxu2 %v2557_v53  ;;  %1158 = vmatpush.msrb.mxu3 %v2563_v42 }
 0x2f9   :  { %1099 = vmatpush.msrb.mxu0 %v2569_v48  ;;  %1119 = vmatpush.msrb.mxu1 %v2575_v39 }
 0x2fa   :  { %1139 = vmatpush.msrb.mxu2 %v2581_v61  ;;  %1159 = vmatpush.msrb.mxu3 %v2587_v4 }
 0x2fb   :  { %1100 = vmatpush.msrb.mxu0 %v2593_v23  ;;  %1120 = vmatpush.msrb.mxu1 %v2599_v63 }
 0x2fc   :  { %1140 = vmatpush.msrb.mxu2 %v2605_v13  ;;  %1160 = vmatpush.msrb.mxu3 %v2611_v9 }
 0x2fd   :  { %1101 = vmatpush.msrb.mxu0 %v2617_v0  ;;  %1121 = vmatpush.msrb.mxu1 %v2623_v47 }
 0x2fe   :  { %1141 = vmatpush.msrb.mxu2 %v2629_v33  ;;  %1161 = vmatpush.msrb.mxu3 %v2635_v3 }
 0x2ff   :  { %1102 = vmatpush.msrb.mxu0 %v2641_v26  ;;  %1122 = vmatpush.msrb.mxu1 %v2647_v45 }
 0x300   :  { %1142 = vmatpush.msrb.mxu2 %v2653_v51  ;;  %1162 = vmatpush.msrb.mxu3 %v2659_v22 }
 0x301   :  { %1103 = vmatpush.msrb.mxu0 %v2665_v36  ;;  %1123 = vmatpush.msrb.mxu1 %v2671_v19 }
 0x302   :  { %1143 = vmatpush.msrb.mxu2 %v3308_v34  ;;  %1163 = vmatpush.msrb.mxu3 %v3309_v7 }
 0x303   :  { %1104 = vmatpush.msrb.mxu0 %v3310_v10  ;;  %1124 = vmatpush.msrb.mxu1 %v3311_v24 }
 0x304   :  { %1144 = vmatpush.msrb.mxu2 %v3312_v12  ;;  %1164 = vmatpush.msrb.mxu3 %v3313_v18 }
 0x305   :  { %1105 = vmatpush.msrb.mxu0 %v3314_v46  ;;  %1125 = vmatpush.msrb.mxu1 %v3315_v49 }
 0x306   :  { %1145 = vmatpush.msrb.mxu2 %v3316_v32  ;;  %1165 = vmatpush.msrb.mxu3 %v3317_v21 }
 0x307   :  { %1106 = vmatpush.msrb.mxu0 %v3318_v41  ;;  %1126 = vmatpush.msrb.mxu1 %v3319_v38 }
 0x308   :  { %1146 = vmatpush.msrb.mxu2 %v3320_v37  ;;  %1166 = vmatpush.msrb.mxu3 %v3321_v40  ;;  %v3334_v40 = vld [vmem:[#allocation25_spill] sm:$0xff]  ;;  %v3335_v37 = vld [vmem:[#allocation27_spill] sm:$0xff] }
 0x309   :  { %1107 = vmatpush.msrb.mxu0 %v3322_v43  ;;  %1127 = vmatpush.msrb.mxu1 %v3323_v35  ;;  %v3333_v43 = vld [vmem:[#allocation35_spill] sm:$0xff] }
 0x30a   :  { %1147 = vmatpush.msrb.mxu2 %v3324_v31  ;;  %1167 = vmatpush.msrb.mxu3 %v3325_v25 }
 0x30b   :  { %1108 = vmatpush.msrb.mxu0 %v3326_v16  ;;  %1128 = vmatpush.msrb.mxu1 %v3327_v55 }
 0x30c   :  { %1148 = vmatpush.msrb.mxu2 %v3328_v6  ;;  %1168 = vmatpush.msrb.mxu3 %v3329_v29  ;;  %v3336_v29 = vld [vmem:[#allocation26_spill] sm:$0xff] }
 0x30d   :  { %1109 = vmatpush.msrb.mxu0 %v3330_v58  ;;  %1129 = vmatpush.msrb.mxu1 %v3331_v1 }
 0x30e   :  { %1149 = vmatpush.msrb.mxu2 %v3332_v15  ;;  %1169 = vmatpush.msrb.mxu3 %v3333_v43 }
 0x36a   :  { %v815_v35 = vpop.f32.mrf.mxu0  ;;  %v835_v31 = vpop.f32.mrf.mxu1 }
 0x36b   :  { %v878_v25 = vadd.f32 %v815_v35, %v3334_v40  ;;  %v898_v16 = vadd.f32 %v835_v31, %v3335_v37  ;;  %v3337_v31 = vld [vmem:[#allocation28_spill] sm:$0xff] }
 0x36d   :  { %v1471_v38 = vmul.f32 -1.442695, %v878_v25  ;;  %v1472_v55 = vmul.f32 -1.442695, %v898_v16 }
 0x36f   :  { %1549 = vpow2.f32 %v1471_v38 }
 0x370   :  { %1551 = vpow2.f32 %v1472_v55 }
 0x371   :  { %v875_v6 = vpop.f32.mrf.mxu3  ;;  %v855_v43 = vpop.f32.mrf.mxu2 }
 0x372   :  { %v920_v41 = vadd.f32 %v875_v6, %v3336_v29  ;;  %v918_v25 = vadd.f32 %v855_v43, %v3337_v31 }
 0x374   :  { %v1473_v58 = vmul.f32 -1.442695, %v920_v41 }
 0x375   :  { %v1550_v21 = vpop.eup %1549 }
 0x376   :  { %v1552_v1 = vpop.eup %1551  ;;  %v882_v32 = vadd.f32 1.0, %v1550_v21  ;;  %1553 = vpow2.f32 %v1473_v58 }
 0x377   :  { %v902_v15 = vadd.f32 1.0, %v1552_v1 }
 0x378   :  { %1555 = vrcp.f32 %v882_v32  ;;  %v894_v41 = vand.u32 2147483648, %v882_v32  ;;  %v892_v58 = vand.u32 2147483647, %v882_v32  ;;  %vm888_vm3 = vweird.f32 %v882_v32 }
 0x379   :  { %1557 = vrcp.f32 %v902_v15  ;;  %v914_v29 = vand.u32 2147483648, %v902_v15  ;;  %v912_v46 = vand.u32 2147483647, %v902_v15  ;;  %vm908_vm4 = vweird.f32 %v902_v15 }
 0x37a   :  { %v895_v43 = vor.u32 1.1754944e-38, %v894_v41  ;;  %vm893_vm7 = vcmp.eq.f32.partialorder %v892_v58, 8.507059e+37 }
 0x37b   :  { %vm913_vm8 = vcmp.eq.f32.partialorder %v912_v46, 8.507059e+37 }
 0x37c   :  { %v1554_v49 = vpop.eup %1553 }
 0x37d   :  { %v924_v35 = vadd.f32 1.0, %v1554_v49 }
 0x37e   :  { %v1556_v40 = vpop.eup %1555 }
 0x37f   :  { %v1558_v16 = vpop.eup %1557  ;;  %v884_v38 = vmul.f32 %v1556_v40, %v882_v32  ;;  %1559 = vrcp.f32 %v924_v35  ;;  %vm889_vm1 = vweird.f32 %v1556_v40  ;;  %v936_v41 = vand.u32 2147483648, %v924_v35 }
 0x380   :  { %v904_v55 = vmul.f32 %v1558_v16, %v902_v15  ;;  %1561 = vtanh.f32 %v918_v25  ;;  %vm909_vm2 = vweird.f32 %v1558_v16  ;;  %vm890_vm5 = vmor %vm888_vm3, %vm889_vm1  ;;  %vm930_vm10 = vweird.f32 %v924_v35 }
 0x381   :  { %v885_v37 = vsub.f32 1.0, %v884_v38  ;;  %vm910_vm6 = vmor %vm908_vm4, %vm909_vm2  ;;  %v915_v38 = vor.u32 1.1754944e-38, %v914_v29  ;;  %v937_v58 = vor.u32 1.1754944e-38, %v936_v41 }
 0x382   :  { %v905_v6 = vsub.f32 1.0, %v904_v55 }
 0x383   :  { %v886_v21 = vmul.f32 %v1556_v40, %v885_v37 }
 0x384   :  { %v906_v1 = vmul.f32 %v1558_v16, %v905_v6 }
 0x385   :  { %v1560_v18 = vpop.eup %1559  ;;  %v887_v49 = vadd.f32 %v1556_v40, %v886_v21 }
 0x386   :  { %v907_v31 = vadd.f32 %v1558_v16, %v906_v1  ;;  %v926_v12 = vmul.f32 %v1560_v18, %v924_v35  ;;  %v1562_v25 = vpop.eup %1561  ;;  %vm931_vm9 = vweird.f32 %v1560_v18  ;;  %v3367_v1 = vld [vmem:[#allocation28_spill] sm:$0xff] }
 0x387   :  { %v891_v55 = vsel %vm890_vm5, %v1556_v40, %v887_v49  ;;  %v934_v40 = vand.u32 2147483647, %v924_v35  ;;  %vm932_vm11 = vmor %vm930_vm10, %vm931_vm9 }
 0x388   :  { %v896_v24 = vsel %vm893_vm7, %v895_v43, %v891_v55  ;;  %v911_v37 = vsel %vm910_vm6, %v1558_v16, %v907_v31  ;;  %v927_v10 = vsub.f32 1.0, %v926_v12 }
 0x389   :  { %v916_v6 = vsel %vm913_vm8, %v915_v38, %v911_v37  ;;  %v941_v7 = vmul.f32 %v1562_v25, %v896_v24  ;;  %vm935_vm12 = vcmp.eq.f32.partialorder %v934_v40, 8.507059e+37 }
 0x38a   :  { %v940_v34 = vmul.f32 %v916_v6, %v2835_v28  ;;  %v928_v21 = vmul.f32 %v1560_v18, %v927_v10 }
 0x38c   :  { %v2913_v32 = vadd.f32 %v941_v7, %v940_v34  ;;  %v929_v15 = vadd.f32 %v1560_v18, %v928_v21 }
 0x38e   :  { %1563 = vtanh.f32 %v2913_v32  ;;  %v933_v29 = vsel %vm932_vm11, %v1560_v18, %v929_v15 }
 0x38f   :  { %v938_v12 = vsel %vm935_vm12, %v937_v58, %v933_v29 }
 0x394   :  { %v1564_v46 = vpop.eup %1563 }
 0x395   :  { %v2916_v31 = vmul.f32 %v1564_v46, %v938_v12 }
 0x397   :  { %962 = vmatmul.f32.vlgmr.msra.gmra.mxu0 %v2916_v31  ;;  %982 = vmatmul.f32.vlgmr.msra.gmra.mxu1 %v2916_v31 }
 0x398   :  { %1002 = vmatmul.f32.vlgmr.msra.gmra.mxu2 %v2916_v31  ;;  %1022 = vmatmul.f32.vlgmr.msra.gmra.mxu3 %v2916_v31 }
 0x399   :  { %1242 = vmatpush.msra.mxu0 %v2371_v44  ;;  %1262 = vmatpush.msra.mxu1 %v2475_v30  ;;  %v3338_v44 = vld [vmem:[#allocation4_spill] sm:$0xff]  ;;  %v3343_v30 = vld [vmem:[#allocation9_spill] sm:$0xff] }
 0x39a   :  { %1282 = vmatpush.msra.mxu2 %v2378_v27  ;;  %1302 = vmatpush.msra.mxu3 %v2482_v52  ;;  %v3339_v27 = vld [vmem:[#allocation5_spill] sm:$0xff]  ;;  %v3344_v52 = vld [vmem:[#allocation10_spill] sm:$0xff] }
 0x39b   :  { %1243 = vmatpush.msra.mxu0 %v2385_v59  ;;  %1263 = vmatpush.msra.mxu1 %v2489_v54  ;;  %v3340_v59 = vld [vmem:[#allocation6_spill] sm:$0xff]  ;;  %v3345_v54 = vld [vmem:[#allocation11_spill] sm:$0xff] }
 0x39c   :  { %1283 = vmatpush.msra.mxu2 %v2495_v56  ;;  %1303 = vmatpush.msra.mxu3 %v2501_v60  ;;  %v3346_v56 = vld [vmem:[#allocation12_spill] sm:$0xff]  ;;  %v3347_v60 = vld [vmem:[#allocation22_spill] sm:$0xff] }
 0x39d   :  { %1244 = vmatpush.msra.mxu0 %v2394_v50  ;;  %1264 = vmatpush.msra.mxu1 %v2508_v62  ;;  %v3341_v50 = vld [vmem:[#allocation7_spill] sm:$0xff]  ;;  %v3348_v62 = vld [vmem:[#allocation13_spill] sm:$0xff] }
 0x39e   :  { %1284 = vmatpush.msra.mxu2 %v2514_v2  ;;  %1304 = vmatpush.msra.mxu3 %v2520_v5  ;;  %v3349_v2 = vld [vmem:[#allocation19_spill] sm:$0xff]  ;;  %v3350_v5 = vld [vmem:[#allocation14_spill] sm:$0xff] }
 0x39f   :  { %1245 = vmatpush.msra.mxu0 %v2403_v20  ;;  %1265 = vmatpush.msra.mxu1 %v2527_v8  ;;  %v3342_v20 = vld [vmem:[#allocation8_spill] sm:$0xff]  ;;  %v3351_v8 = vld [vmem:[#allocation23_spill] sm:$0xff] }
 0x3a0   :  { %1285 = vmatpush.msra.mxu2 %v2533_v11  ;;  %1305 = vmatpush.msra.mxu3 %v2539_v14  ;;  %v3352_v11 = vld [vmem:[#allocation15_spill] sm:$0xff]  ;;  %v3353_v14 = vld [vmem:[#allocation20_spill] sm:$0xff] }
 0x3a1   :  { %1246 = vmatpush.msra.mxu0 %v2545_v17  ;;  %1266 = vmatpush.msra.mxu1 %v2551_v57  ;;  %v3354_v17 = vld [vmem:[#allocation16_spill] sm:$0xff] }
 0x3a2   :  { %1286 = vmatpush.msra.mxu2 %v2557_v53  ;;  %1306 = vmatpush.msra.mxu3 %v2563_v42  ;;  %v3355_v57 = vld [vmem:[#allocation24_spill] sm:$0xff]  ;;  %v3356_v53 = vld [vmem:[#allocation17_spill] sm:$0xff] }
 0x3a3   :  { %1247 = vmatpush.msra.mxu0 %v2569_v48  ;;  %1267 = vmatpush.msra.mxu1 %v2575_v39  ;;  %v3357_v42 = vld [vmem:[#allocation21_spill] sm:$0xff]  ;;  %v3358_v48 = vld [vmem:[#allocation30_spill] sm:$0xff]  ;;  %v3359_v39 = vld [vmem:[#allocation31_spill] sm:$0xff] }
 0x3a4   :  { %1287 = vmatpush.msra.mxu2 %v2581_v61  ;;  %1307 = vmatpush.msra.mxu3 %v2587_v4  ;;  %v3360_v61 = vld [vmem:[#allocation32_spill] sm:$0xff]  ;;  %v3361_v4 = vld [vmem:[#allocation33_spill] sm:$0xff] }
 0x3a5   :  { %1248 = vmatpush.msra.mxu0 %v2593_v23  ;;  %1268 = vmatpush.msra.mxu1 %v2599_v63  ;;  %v3362_v23 = vld [vmem:[#allocation34_spill] sm:$0xff]  ;;  %v3363_v63 = vld [vmem:[#allocation35_spill] sm:$0xff] }
 0x3a6   :  { %1288 = vmatpush.msra.mxu2 %v2605_v13  ;;  %1308 = vmatpush.msra.mxu3 %v2611_v9 }
 0x3a7   :  { %1249 = vmatpush.msra.mxu0 %v2617_v0  ;;  %1269 = vmatpush.msra.mxu1 %v2623_v47  ;;  %v3364_v0 = vld [vmem:[#allocation25_spill] sm:$0xff] }
 0x3a8   :  { %1289 = vmatpush.msra.mxu2 %v2629_v33  ;;  %1309 = vmatpush.msra.mxu3 %v2635_v3  ;;  %v3365_v33 = vld [vmem:[#allocation27_spill] sm:$0xff] }
 0x3a9   :  { %1250 = vmatpush.msra.mxu0 %v2641_v26  ;;  %1270 = vmatpush.msra.mxu1 %v2647_v45 }
 0x3aa   :  { %1290 = vmatpush.msra.mxu2 %v2653_v51  ;;  %1310 = vmatpush.msra.mxu3 %v2659_v22  ;;  %v3366_v22 = vld [vmem:[#allocation26_spill] sm:$0xff] }
 0x3ab   :  { %1251 = vmatpush.msra.mxu0 %v2665_v36  ;;  %1271 = vmatpush.msra.mxu1 %v2671_v19 }
 0x3ac   :  { %1291 = vmatpush.msra.mxu2 %v3338_v44  ;;  %1311 = vmatpush.msra.mxu3 %v3339_v27 }
 0x3ad   :  { %1252 = vmatpush.msra.mxu0 %v3340_v59  ;;  %1272 = vmatpush.msra.mxu1 %v3341_v50 }
 0x3ae   :  { %1292 = vmatpush.msra.mxu2 %v3342_v20  ;;  %1312 = vmatpush.msra.mxu3 %v3343_v30 }
 0x3af   :  { %1253 = vmatpush.msra.mxu0 %v3344_v52  ;;  %1273 = vmatpush.msra.mxu1 %v3345_v54 }
 0x3b0   :  { %1293 = vmatpush.msra.mxu2 %v3346_v56  ;;  %1313 = vmatpush.msra.mxu3 %v3347_v60 }
 0x3b1   :  { %1254 = vmatpush.msra.mxu0 %v3348_v62  ;;  %1274 = vmatpush.msra.mxu1 %v3349_v2 }
 0x3b2   :  { %1294 = vmatpush.msra.mxu2 %v3350_v5  ;;  %1314 = vmatpush.msra.mxu3 %v3351_v8 }
 0x3b3   :  { %1255 = vmatpush.msra.mxu0 %v3352_v11  ;;  %1275 = vmatpush.msra.mxu1 %v3353_v14 }
 0x3b4   :  { %1295 = vmatpush.msra.mxu2 %v3354_v17  ;;  %1315 = vmatpush.msra.mxu3 %v3355_v57 }
 0x3b5   :  { %1256 = vmatpush.msra.mxu0 %v3356_v53  ;;  %1276 = vmatpush.msra.mxu1 %v3357_v42 }
 0x3b6   :  { %1296 = vmatpush.msra.mxu2 %v3358_v48  ;;  %1316 = vmatpush.msra.mxu3 %v3359_v39  ;;  %v101_v39 = vld [vmem:[%s3108_s4 + $0x70] sm:$0xff] }
 0x3b7   :  { %1257 = vmatpush.msra.mxu0 %v3360_v61  ;;  %1277 = vmatpush.msra.mxu1 %v3361_v4  ;;  %v100_v61 = vld [vmem:[%s3108_s4 + $0x68] sm:$0xff]  ;;  %v99_v4 = vld [vmem:[%s3108_s4 + $0x60] sm:$0xff] }
 0x3b8   :  { %1297 = vmatpush.msra.mxu2 %v3362_v23  ;;  %1317 = vmatpush.msra.mxu3 %v3363_v63  ;;  %v98_v23 = vld [vmem:[%s3108_s4 + $0x58] sm:$0xff] }
 0x414   :  { %v963_v13 = vpop.f32.mrf.mxu0  ;;  %v983_v9 = vpop.f32.mrf.mxu1 }
 0x415   :  { %v1026_v47 = vadd.f32 %v963_v13, %v3364_v0  ;;  %v1046_v3 = vadd.f32 %v983_v9, %v3365_v33  ;;  %v97_v9 = vld [vmem:[%s3108_s4 + $0x50] sm:$0xff] }
 0x417   :  { %v1474_v26 = vmul.f32 -1.442695, %v1026_v47  ;;  %v1475_v45 = vmul.f32 -1.442695, %v1046_v3 }
 0x419   :  { %1565 = vpow2.f32 %v1474_v26  ;;  %v96_v26 = vld [vmem:[%s3108_s4 + $0x48] sm:$0xff] }
 0x41a   :  { %1567 = vpow2.f32 %v1475_v45 }
 0x41b   :  { %v1023_v51 = vpop.f32.mrf.mxu3  ;;  %v1003_v24 = vpop.f32.mrf.mxu2 }
 0x41c   :  { %v1068_v36 = vadd.f32 %v1023_v51, %v3366_v22  ;;  %v1066_v49 = vadd.f32 %v1003_v24, %v3367_v1 }
 0x41e   :  { %v1476_v19 = vmul.f32 -1.442695, %v1068_v36  ;;  %v95_v36 = vld [vmem:[%s3108_s4 + $0x40] sm:$0xff] }
 0x41f   :  { %v1566_v28 = vpop.eup %1565 }
 0x420   :  { %v1568_v34 = vpop.eup %1567  ;;  %v1030_v7 = vadd.f32 1.0, %v1566_v28  ;;  %1569 = vpow2.f32 %v1476_v19  ;;  %v94_v19 = vld [vmem:[%s3108_s4 + $0x38] sm:$0xff]  ;;  %v93_v28 = vld [vmem:[%s3108_s4 + $0x30] sm:$0xff] }
 0x421   :  { %v1050_v10 = vadd.f32 1.0, %v1568_v34 }
 0x422   :  { %1571 = vrcp.f32 %v1030_v7  ;;  %v1042_v6 = vand.u32 2147483648, %v1030_v7  ;;  %v1040_v41 = vand.u32 2147483647, %v1030_v7  ;;  %vm1036_vm15 = vweird.f32 %v1030_v7 }
 0x423   :  { %1573 = vrcp.f32 %v1050_v10  ;;  %v1062_v21 = vand.u32 2147483648, %v1050_v10  ;;  %v1060_v29 = vand.u32 2147483647, %v1050_v10  ;;  %vm1056_vm0 = vweird.f32 %v1050_v10 }
 0x424   :  { %v1043_v12 = vor.u32 1.1754944e-38, %v1042_v6  ;;  %vm1041_vm3 = vcmp.eq.f32.partialorder %v1040_v41, 8.507059e+37 }
 0x425   :  { %v1063_v59 = vor.u32 1.1754944e-38, %v1062_v21  ;;  %vm1061_vm4 = vcmp.eq.f32.partialorder %v1060_v29, 8.507059e+37  ;;  %v87_v21 = vld [vmem:[%s3108_s4] sm:$0xff] }
 0x426   :  { %v1570_v18 = vpop.eup %1569 }
 0x427   :  { %v1072_v35 = vadd.f32 1.0, %v1570_v18  ;;  %v91_v18 = vld [vmem:[%s3108_s4 + $0x20] sm:$0xff] }
 0x428   :  { %v1572_v16 = vpop.eup %1571 }
 0x429   :  { %v1574_v43 = vpop.eup %1573  ;;  %v1032_v38 = vmul.f32 %v1572_v16, %v1030_v7  ;;  %1575 = vrcp.f32 %v1072_v35  ;;  %vm1037_vm13 = vweird.f32 %v1572_v16  ;;  %v1084_v11 = vand.u32 2147483648, %v1072_v35 }
 0x42a   :  { %v1052_v55 = vmul.f32 %v1574_v43, %v1050_v10  ;;  %1577 = vtanh.f32 %v1066_v49  ;;  %vm1057_vm14 = vweird.f32 %v1574_v43  ;;  %vm1038_vm1 = vmor %vm1036_vm15, %vm1037_vm13  ;;  %vm1078_vm6 = vweird.f32 %v1072_v35  ;;  %v92_v10 = vld [vmem:[%s3108_s4 + $0x28] sm:$0xff] }
 0x42b   :  { %v1033_v25 = vsub.f32 1.0, %v1032_v38  ;;  %vm1058_vm2 = vmor %vm1056_vm0, %vm1057_vm14  ;;  %v1082_v14 = vand.u32 2147483647, %v1072_v35  ;;  %v1085_v57 = vor.u32 1.1754944e-38, %v1084_v11  ;;  %v90_v38 = vld [vmem:[%s3108_s4 + $0x18] sm:$0xff] }
 0x42c   :  { %v1053_v37 = vsub.f32 1.0, %v1052_v55  ;;  %v89_v55 = vld [vmem:[%s3108_s4 + $0x10] sm:$0xff] }
 0x42d   :  { %v1034_v15 = vmul.f32 %v1572_v16, %v1033_v25  ;;  %vm1083_vm8 = vcmp.eq.f32.partialorder %v1082_v14, 8.507059e+37  ;;  %v88_v25 = vld [vmem:[%s3108_s4 + $0x8] sm:$0xff] }
 0x42e   :  { %v1054_v40 = vmul.f32 %v1574_v43, %v1053_v37 }
 0x42f   :  { %v1576_v58 = vpop.eup %1575  ;;  %v1035_v46 = vadd.f32 %v1572_v16, %v1034_v15 }
 0x430   :  { %v1055_v44 = vadd.f32 %v1574_v43, %v1054_v40  ;;  %v1074_v27 = vmul.f32 %v1576_v58, %v1072_v35  ;;  %v1578_v20 = vpop.eup %1577  ;;  %vm1079_vm5 = vweird.f32 %v1576_v58 }
 0x431   :  { %v1039_v50 = vsel %vm1038_vm1, %v1572_v16, %v1035_v46  ;;  %vm1080_vm7 = vmor %vm1078_vm6, %vm1079_vm5 }
 0x432   :  { %v1044_v30 = vsel %vm1041_vm3, %v1043_v12, %v1039_v50  ;;  %v1059_v52 = vsel %vm1058_vm2, %v1574_v43, %v1055_v44  ;;  %v1075_v54 = vsub.f32 1.0, %v1074_v27 }
 0x433   :  { %v1064_v56 = vsel %vm1061_vm4, %v1063_v59, %v1059_v52  ;;  %v1089_v60 = vmul.f32 %v1578_v20, %v1044_v30 }
 0x434   :  { %v1088_v62 = vmul.f32 %v1064_v56, %v2913_v32  ;;  %v1076_v2 = vmul.f32 %v1576_v58, %v1075_v54  ;;  %v102_v32 = vld [vmem:[%s3108_s4 + $0x78] sm:$0xff] }
 0x436   :  { %v2991_v5 = vadd.f32 %v1089_v60, %v1088_v62  ;;  %v1077_v8 = vadd.f32 %v1576_v58, %v1076_v2 }
 0x438   :  { %1579 = vtanh.f32 %v2991_v5  ;;  %v1081_v17 = vsel %vm1080_vm7, %v1576_v58, %v1077_v8 }
 0x439   :  { %v1086_v42 = vsel %vm1083_vm8, %v1085_v57, %v1081_v17 }
 0x43e   :  { %v1580_v53 = vpop.eup %1579 }
 0x43f   :  { %v2994_v48 = vmul.f32 %v1580_v53, %v1086_v42 }
 0x441   :  { %1110 = vmatmul.f32.vlgmr.msrb.gmra.mxu0 %v2994_v48  ;;  %1130 = vmatmul.f32.vlgmr.msrb.gmra.mxu1 %v2994_v48 }
 0x442   :  { %1150 = vmatmul.f32.vlgmr.msrb.gmra.mxu2 %v2994_v48  ;;  %1170 = vmatmul.f32.vlgmr.msrb.gmra.mxu3 %v2994_v48 }
 0x443   :  { %1402 = vmatpush.msrb.mxu0 %v102_v32 }
 0x445   :  { %1403 = vmatpush.msrb.mxu0 %v101_v39 }
 0x447   :  { %1404 = vmatpush.msrb.mxu0 %v100_v61 }
 0x449   :  { %1405 = vmatpush.msrb.mxu0 %v99_v4 }
 0x44b   :  { %1406 = vmatpush.msrb.mxu0 %v98_v23 }
 0x44d   :  { %1407 = vmatpush.msrb.mxu0 %v97_v9 }
 0x44f   :  { %1408 = vmatpush.msrb.mxu0 %v96_v26 }
 0x451   :  { %1409 = vmatpush.msrb.mxu0 %v95_v36  ;;  %v3370_v36 = vld [vmem:[#allocation3_spill] sm:$0xff] }
 0x453   :  { %1410 = vmatpush.msrb.mxu0 %v94_v19  ;;  %v3371_v19 = vld [vmem:[#allocation36_spill] sm:$0xff] }
 0x455   :  { %1411 = vmatpush.msrb.mxu0 %v93_v28 }
 0x457   :  { %1412 = vmatpush.msrb.mxu0 %v92_v10 }
 0x459   :  { %1413 = vmatpush.msrb.mxu0 %v91_v18 }
 0x45b   :  { %1414 = vmatpush.msrb.mxu0 %v90_v38 }
 0x45d   :  { %1415 = vmatpush.msrb.mxu0 %v89_v55 }
 0x45f   :  { %1416 = vmatpush.msrb.mxu0 %v88_v25 }
 0x461   :  { %1417 = vmatpush.msrb.mxu0 %v87_v21 }
 0x4be   :  { %v1111_v63 = vpop.f32.mrf.mxu0  ;;  %v1131_v13 = vpop.f32.mrf.mxu1 }
 0x4bf   :  { %v1174_v47 = vadd.f32 %v1111_v63, %v3364_v0  ;;  %v1194_v3 = vadd.f32 %v1131_v13, %v3365_v33 }
 0x4c1   :  { %v1477_v45 = vmul.f32 -1.442695, %v1174_v47  ;;  %v1478_v51 = vmul.f32 -1.442695, %v1194_v3 }
 0x4c3   :  { %1581 = vpow2.f32 %v1477_v45 }
 0x4c4   :  { %1583 = vpow2.f32 %v1478_v51  ;;  %v3369_v51 = vld [vmem:[#allocation18_spill] sm:$0xff] }
 0x4c5   :  { %v1171_v34 = vpop.f32.mrf.mxu3  ;;  %v1151_v37 = vpop.f32.mrf.mxu2 }
 0x4c6   :  { %v1216_v7 = vadd.f32 %v1171_v34, %v3366_v22  ;;  %v1214_v40 = vadd.f32 %v1151_v37, %v3367_v1 }
 0x4c8   :  { %v1479_v24 = vmul.f32 -1.442695, %v1216_v7 }
 0x4c9   :  { %v1582_v35 = vpop.eup %1581 }
 0x4ca   :  { %v1584_v16 = vpop.eup %1583  ;;  %v1178_v49 = vadd.f32 1.0, %v1582_v35  ;;  %1585 = vpow2.f32 %v1479_v24  ;;  %v3067_v35 = vld [vmem:[%s3109_s5] ss:$0 sm:$0xff] }
 0x4cb   :  { %v1198_v43 = vadd.f32 1.0, %v1584_v16 }
 0x4cc   :  { %1587 = vrcp.f32 %v1178_v49  ;;  %v1190_v27 = vand.u32 2147483648, %v1178_v49  ;;  %v1188_v20 = vand.u32 2147483647, %v1178_v49  ;;  %vm1184_vm11 = vweird.f32 %v1178_v49 }
 0x4cd   :  { %1589 = vrcp.f32 %v1198_v43  ;;  %v1210_v59 = vand.u32 2147483648, %v1198_v43  ;;  %v1208_v52 = vand.u32 2147483647, %v1198_v43  ;;  %vm1204_vm12 = vweird.f32 %v1198_v43 }
 0x4ce   :  { %v1191_v60 = vor.u32 1.1754944e-38, %v1190_v27  ;;  %vm1189_vm15 = vcmp.eq.f32.partialorder %v1188_v20, 8.507059e+37 }
 0x4cf   :  { %v1211_v8 = vor.u32 1.1754944e-38, %v1210_v59  ;;  %vm1209_vm0 = vcmp.eq.f32.partialorder %v1208_v52, 8.507059e+37 }
 0x4d0   :  { %v1586_v6 = vpop.eup %1585 }
 0x4d1   :  { %v1220_v15 = vadd.f32 1.0, %v1586_v6 }
 0x4d2   :  { %v1588_v41 = vpop.eup %1587 }
 0x4d3   :  { %v1590_v29 = vpop.eup %1589  ;;  %v1180_v58 = vmul.f32 %v1588_v41, %v1178_v49  ;;  %1591 = vrcp.f32 %v1220_v15  ;;  %vm1185_vm9 = vweird.f32 %v1588_v41  ;;  %v1232_v63 = vand.u32 2147483648, %v1220_v15 }
 0x4d4   :  { %v1200_v46 = vmul.f32 %v1590_v29, %v1198_v43  ;;  %1593 = vtanh.f32 %v1214_v40  ;;  %vm1205_vm10 = vweird.f32 %v1590_v29  ;;  %vm1186_vm13 = vmor %vm1184_vm11, %vm1185_vm9  ;;  %vm1226_vm2 = vweird.f32 %v1220_v15 }
 0x4d5   :  { %v1181_v12 = vsub.f32 1.0, %v1180_v58  ;;  %vm1206_vm14 = vmor %vm1204_vm12, %vm1205_vm10  ;;  %v1230_v13 = vand.u32 2147483647, %v1220_v15  ;;  %v1233_v47 = vor.u32 1.1754944e-38, %v1232_v63 }
 0x4d6   :  { %v1201_v44 = vsub.f32 1.0, %v1200_v46 }
 0x4d7   :  { %v1182_v50 = vmul.f32 %v1588_v41, %v1181_v12  ;;  %vm1231_vm4 = vcmp.eq.f32.partialorder %v1230_v13, 8.507059e+37 }
 0x4d8   :  { %v1202_v30 = vmul.f32 %v1590_v29, %v1201_v44 }
 0x4d9   :  { %v1592_v54 = vpop.eup %1591  ;;  %v1183_v56 = vadd.f32 %v1588_v41, %v1182_v50 }
 0x4da   :  { %v1203_v62 = vadd.f32 %v1590_v29, %v1202_v30  ;;  %v1222_v2 = vmul.f32 %v1592_v54, %v1220_v15  ;;  %v1594_v14 = vpop.eup %1593  ;;  %vm1227_vm1 = vweird.f32 %v1592_v54 }
 0x4db   :  { %v1187_v11 = vsel %vm1186_vm13, %v1588_v41, %v1183_v56  ;;  %vm1228_vm3 = vmor %vm1226_vm2, %vm1227_vm1 }
 0x4dc   :  { %v1192_v17 = vsel %vm1189_vm15, %v1191_v60, %v1187_v11  ;;  %v1207_v57 = vsel %vm1206_vm14, %v1590_v29, %v1203_v62  ;;  %v1223_v53 = vsub.f32 1.0, %v1222_v2 }
 0x4dd   :  { %v1212_v42 = vsel %vm1209_vm0, %v1211_v8, %v1207_v57  ;;  %v1237_v32 = vmul.f32 %v1594_v14, %v1192_v17 }
 0x4de   :  { %v1236_v39 = vmul.f32 %v1212_v42, %v2991_v5  ;;  %v1224_v61 = vmul.f32 %v1592_v54, %v1223_v53  ;;  %v3368_v5 = vld [vmem:[#allocation29_spill] sm:$0xff] }
 0x4e0   :  { %v3053_v4 = vadd.f32 %v1237_v32, %v1236_v39  ;;  %v1225_v23 = vadd.f32 %v1592_v54, %v1224_v61 }
 0x4e2   :  { %1595 = vtanh.f32 %v3053_v4  ;;  %v1229_v9 = vsel %vm1228_vm3, %v1592_v54, %v1225_v23 }
 0x4e3   :  { %v1234_v26 = vsel %vm1231_vm4, %v1233_v47, %v1229_v9 }
 0x4e8   :  { %v1596_v3 = vpop.eup %1595 }
 0x4e9   :  { %v1240_v45 = vmul.f32 %v1596_v3, %v1234_v26 }
 0x4eb   :  { %1258 = vmatmul.f32.vlgmr.msra.gmra.mxu0 %v1240_v45  ;;  %1278 = vmatmul.f32.vlgmr.msra.gmra.mxu1 %v1240_v45 }
 0x4ec   :  { %1298 = vmatmul.f32.vlgmr.msra.gmra.mxu2 %v1240_v45  ;;  %1318 = vmatmul.f32.vlgmr.msra.gmra.mxu3 %v1240_v45 }
 0x4f3   :  { %1418 = vmatmul.f32.vlgmr.msrb.gmra.mxu0 %v3368_v5 }
 0x4fb   :  { %1421 = vmatmul.f32.gmra.mxu0 %v3369_v51 }
 0x503   :  { %1424 = vmatmul.f32.gmra.mxu0 %v3370_v36 }
 0x50b   :  { %1427 = vmatmul.f32.gmra.mxu0 %v3371_v19 }
 0x513   :  { %1430 = vmatmul.f32.gmra.mxu0 %v2916_v31 }
 0x51b   :  { %1433 = vmatmul.f32.gmra.mxu0 %v2994_v48 }
 0x523   :  { %1436 = vmatmul.f32.gmra.mxu0 %v1240_v45 }
 0x568   :  { %v1259_v28 = vpop.f32.mrf.mxu0  ;;  %v1279_v34 = vpop.f32.mrf.mxu1 }
 0x569   :  { %v1322_v7 = vadd.f32 %v1259_v28, %v3364_v0  ;;  %v1342_v10 = vadd.f32 %v1279_v34, %v3365_v33 }
 0x56b   :  { %v1480_v24 = vmul.f32 -1.442695, %v1322_v7  ;;  %v1481_v18 = vmul.f32 -1.442695, %v1342_v10 }
 0x56d   :  { %1597 = vpow2.f32 %v1480_v24 }
 0x56e   :  { %1599 = vpow2.f32 %v1481_v18 }
 0x56f   :  { %v1319_v16 = vpop.f32.mrf.mxu3  ;;  %v1299_v37 = vpop.f32.mrf.mxu2 }
 0x570   :  { %v1364_v31 = vadd.f32 %v1319_v16, %v3366_v22  ;;  %v1419_v48 = vpop.f32.mrf.mxu0  ;;  %v1362_v41 = vadd.f32 %v1299_v37, %v3367_v1 }
 0x571   :  { %v1420_v49 = vadd.f32 %v3067_v35, %v1419_v48 }
 0x572   :  { %v1482_v43 = vmul.f32 -1.442695, %v1364_v31 }
 0x573   :  { %v1598_v38 = vpop.eup %1597  ;;  %1443 = vst [vmem:[%s3110_s6] sm:$0xff] %v1420_v49 }
 0x574   :  { %v1600_v0 = vpop.eup %1599  ;;  %v1326_v33 = vadd.f32 1.0, %v1598_v38  ;;  %1601 = vpow2.f32 %v1482_v43 }
 0x575   :  { %v1346_v55 = vadd.f32 1.0, %v1600_v0 }
 0x576   :  { %1603 = vrcp.f32 %v1326_v33  ;;  %v1336_v44 = vand.u32 2147483647, %v1326_v33  ;;  %v1338_v27 = vand.u32 2147483648, %v1326_v33  ;;  %vm1332_vm7 = vweird.f32 %v1326_v33 }
 0x577   :  { %1605 = vrcp.f32 %v1346_v55  ;;  %v1358_v50 = vand.u32 2147483648, %v1346_v55  ;;  %v1356_v54 = vand.u32 2147483647, %v1346_v55  ;;  %vm1352_vm8 = vweird.f32 %v1346_v55 }
 0x578   :  { %v1422_v25 = vpop.f32.mrf.mxu0  ;;  %v1339_v60 = vor.u32 1.1754944e-38, %v1338_v27  ;;  %vm1337_vm10 = vcmp.eq.f32.partialorder %v1336_v44, 8.507059e+37 }
 0x579   :  { %v1423_v6 = vadd.f32 %v3067_v35, %v1422_v25  ;;  %v1359_v8 = vor.u32 1.1754944e-38, %v1358_v50  ;;  %vm1357_vm12 = vcmp.eq.f32.partialorder %v1356_v54, 8.507059e+37 }
 0x57a   :  { %v1602_v22 = vpop.eup %1601 }
 0x57b   :  { %v1368_v21 = vadd.f32 1.0, %v1602_v22  ;;  %1444 = vst [vmem:[%s3110_s6 + $0x8] sm:$0xff] %v1423_v6 }
 0x57c   :  { %v1604_v15 = vpop.eup %1603 }
 0x57d   :  { %v1606_v40 = vpop.eup %1605  ;;  %v1328_v29 = vmul.f32 %v1604_v15, %v1326_v33  ;;  %1607 = vrcp.f32 %v1368_v21  ;;  %vm1333_vm5 = vweird.f32 %v1604_v15  ;;  %v1380_v47 = vand.u32 2147483648, %v1368_v21 }
 0x57e   :  { %v1348_v58 = vmul.f32 %v1606_v40, %v1346_v55  ;;  %1609 = vtanh.f32 %v1362_v41  ;;  %vm1353_vm6 = vweird.f32 %v1606_v40  ;;  %vm1334_vm9 = vmor %vm1332_vm7, %vm1333_vm5  ;;  %vm1374_vm14 = vweird.f32 %v1368_v21 }
 0x57f   :  { %v1329_v46 = vsub.f32 1.0, %v1328_v29  ;;  %vm1354_vm11 = vmor %vm1352_vm8, %vm1353_vm6  ;;  %v1378_v3 = vand.u32 2147483647, %v1368_v21  ;;  %v1381_v5 = vor.u32 1.1754944e-38, %v1380_v47 }
 0x580   :  { %v1349_v12 = vsub.f32 1.0, %v1348_v58  ;;  %v1425_v59 = vpop.f32.mrf.mxu0 }
 0x581   :  { %v1330_v20 = vmul.f32 %v1604_v15, %v1329_v46  ;;  %v1426_v30 = vadd.f32 %v3067_v35, %v1425_v59  ;;  %vm1379_vm0 = vcmp.eq.f32.partialorder %v1378_v3, 8.507059e+37 }
 0x582   :  { %v1350_v52 = vmul.f32 %v1606_v40, %v1349_v12 }
 0x583   :  { %v1608_v56 = vpop.eup %1607  ;;  %v1331_v1 = vadd.f32 %v1604_v15, %v1330_v20  ;;  %1445 = vst [vmem:[%s3110_s6 + $0x10] sm:$0xff] %v1426_v30 }
 0x584   :  { %v1351_v62 = vadd.f32 %v1606_v40, %v1350_v52  ;;  %v1370_v2 = vmul.f32 %v1608_v56, %v1368_v21  ;;  %v1610_v14 = vpop.eup %1609  ;;  %vm1375_vm13 = vweird.f32 %v1608_v56 }
 0x585   :  { %v1335_v11 = vsel %vm1334_vm9, %v1604_v15, %v1331_v1  ;;  %vm1376_vm15 = vmor %vm1374_vm14, %vm1375_vm13 }
 0x586   :  { %v1340_v17 = vsel %vm1337_vm10, %v1339_v60, %v1335_v11  ;;  %v1355_v57 = vsel %vm1354_vm11, %v1606_v40, %v1351_v62  ;;  %v1371_v53 = vsub.f32 1.0, %v1370_v2 }
 0x587   :  { %v1385_v42 = vmul.f32 %v1610_v14, %v1340_v17  ;;  %v1360_v32 = vsel %vm1357_vm12, %v1359_v8, %v1355_v57 }
 0x588   :  { %v1428_v39 = vpop.f32.mrf.mxu0  ;;  %v1372_v61 = vmul.f32 %v1608_v56, %v1371_v53  ;;  %v1384_v23 = vmul.f32 %v1360_v32, %v3053_v4 }
 0x589   :  { %v1429_v63 = vadd.f32 %v3067_v35, %v1428_v39 }
 0x58a   :  { %v1386_v13 = vadd.f32 %v1385_v42, %v1384_v23  ;;  %v1373_v9 = vadd.f32 %v1608_v56, %v1372_v61 }
 0x58b   :  { %1446 = vst [vmem:[%s3110_s6 + $0x18] sm:$0xff] %v1429_v63 }
 0x58c   :  { %1611 = vtanh.f32 %v1386_v13  ;;  %v1377_v26 = vsel %vm1376_vm15, %v1608_v56, %v1373_v9 }
 0x58d   :  { %v1382_v36 = vsel %vm1379_vm0, %v1381_v5, %v1377_v26 }
 0x590   :  { %v1431_v45 = vpop.f32.mrf.mxu0 }
 0x591   :  { %v1432_v51 = vadd.f32 %v3067_v35, %v1431_v45 }
 0x592   :  { %v1612_v4 = vpop.eup %1611 }
 0x593   :  { %1447 = vst [vmem:[%s3110_s6 + $0x20] sm:$0xff] %v1432_v51  ;;  %v1388_v19 = vmul.f32 %v1612_v4, %v1382_v36 }
 0x595   :  { %1439 = vmatmul.f32.gmra.mxu0 %v1388_v19 }
 0x598   :  { %v1434_v28 = vpop.f32.mrf.mxu0 }
 0x599   :  { %v1435_v34 = vadd.f32 %v3067_v35, %v1434_v28 }
 0x59b   :  { %1448 = vst [vmem:[%s3110_s6 + $0x28] sm:$0xff] %v1435_v34 }
 0x5a0   :  { %v1437_v7 = vpop.f32.mrf.mxu0 }
 0x5a1   :  { %v1438_v10 = vadd.f32 %v3067_v35, %v1437_v7 }
 0x5a3   :  { %1449 = vst [vmem:[%s3110_s6 + $0x30] sm:$0xff] %v1438_v10 }
 0x612   :  { %v1440_v24 = vpop.f32.mrf.mxu0 }
 0x613   :  { %v1441_v18 = vadd.f32 %v3067_v35, %v1440_v24 }
 0x615   :  { %1450 = vst [vmem:[%s3110_s6 + $0x38] sm:$0xff] %v1441_v18 }

</bundles_post_ra>
